<compile_context>
chip_gen: v5e
topology: v5e:2x2
jax: 0.10.0
libtpu: 0.0.40
codegen_flags: <defaults>
</compile_context>

<pallas_src>
import functools
import math

import jax
import jax.numpy as jnp
import numpy as np
from jax.experimental import pallas as pl
from jax.experimental.pallas import tpu as pltpu


# ----------------------------- kernel helpers -----------------------------
def _attention_core(q, k, v, bias, B, Sq, Skv, H, dk):
    """Per-(batch, head) scaled-dot-product attention.

    q: (B*Sq, H*dk) f32, k/v: (B*Skv, H*dk) f32, bias: (B, Sq, Skv) additive.
    Returns merged-head context rows (B*Sq, H*dk) in f32.
    """
    scale = 1.0 / math.sqrt(dk)
    ctx_rows = []
    for b in range(B):                                  # B is small & static -> unrolled
        qb = q[b * Sq:(b + 1) * Sq].reshape(Sq, H, dk).transpose(1, 0, 2)
        kb = k[b * Skv:(b + 1) * Skv].reshape(Skv, H, dk).transpose(1, 0, 2)
        vb = v[b * Skv:(b + 1) * Skv].reshape(Skv, H, dk).transpose(1, 0, 2)

        s = jnp.einsum('hqd,hkd->hqk',
                       qb.astype(jnp.bfloat16), kb.astype(jnp.bfloat16),
                       preferred_element_type=jnp.float32)
        s = s * scale + bias[b][None, :, :].astype(jnp.float32)   # additive mask bias

        m = jnp.max(s, axis=-1, keepdims=True)
        e = jnp.exp(s - m)
        p = e * pl.reciprocal(jnp.sum(e, axis=-1, keepdims=True), approx=True)

        ctx = jnp.einsum('hqk,hkd->hqd',
                         p.astype(jnp.bfloat16), vb.astype(jnp.bfloat16),
                         preferred_element_type=jnp.float32)
        ctx_rows.append(ctx.transpose(1, 0, 2).reshape(Sq, H * dk))
    if B == 1:
        return ctx_rows[0]
    return jnp.concatenate(ctx_rows, axis=0)            # (B*Sq, D)


def mha_self_attn_kernel(h, x_ref, bias_ref, wqkv_ref, bqkv_ref, wo_ref, bo_ref, o_ref):
    """Self-attention path: fused (D, 3D) QKV weight, single projection matmul."""
    B, S, D = x_ref.shape
    dk = D // h
    x_rows = x_ref[...].reshape(B * S, D).astype(jnp.bfloat16)
    qkv = jnp.dot(x_rows, wqkv_ref[...],
                  preferred_element_type=jnp.float32) + bqkv_ref[...]
    q = qkv[:, :D]
    k = qkv[:, D:2 * D]
    v = qkv[:, 2 * D:]
    ctx = _attention_core(q, k, v, bias_ref[...], B, S, S, h, dk)
    out = jnp.dot(ctx.astype(jnp.bfloat16), wo_ref[...],
                  preferred_element_type=jnp.float32) + bo_ref[...]
    o_ref[...] = out.reshape(B, S, D).astype(o_ref.dtype)


def mha_general_kernel(h, q_ref, k_ref, v_ref, bias_ref,
                       wq_ref, bq_ref, wk_ref, bk_ref, wv_ref, bv_ref,
                       wo_ref, bo_ref, o_ref):
    """General path: distinct query / key / value tensors."""
    B, Sq, D = q_ref.shape
    Skv = k_ref.shape[1]
    dk = D // h
    qr = q_ref[...].reshape(B * Sq, D).astype(jnp.bfloat16)
    kr = k_ref[...].reshape(B * Skv, D).astype(jnp.bfloat16)
    vr = v_ref[...].reshape(B * Skv, D).astype(jnp.bfloat16)
    q = jnp.dot(qr, wq_ref[...], preferred_element_type=jnp.float32) + bq_ref[...]
    k = jnp.dot(kr, wk_ref[...], preferred_element_type=jnp.float32) + bk_ref[...]
    v = jnp.dot(vr, wv_ref[...], preferred_element_type=jnp.float32) + bv_ref[...]
    ctx = _attention_core(q, k, v, bias_ref[...], B, Sq, Skv, h, dk)
    out = jnp.dot(ctx.astype(jnp.bfloat16), wo_ref[...],
                  preferred_element_type=jnp.float32) + bo_ref[...]
    o_ref[...] = out.reshape(B, Sq, D).astype(o_ref.dtype)


# ------------------------------- wrappers ----------------------------------
def _full(shape):
    nd = len(shape)
    return pl.BlockSpec(shape, lambda i: (0,) * nd)


def _mask_bias(mask, B, Sq, Skv):
    # masked_fill(mask == 0, -1e9)  ->  additive bias, bf16 to halve its DMA.
    if mask is None:
        return jnp.zeros((B, Sq, Skv), jnp.bfloat16)
    return jnp.where(mask == 0, -1e9, 0.0).astype(jnp.bfloat16)


_COMPILER_PARAMS = pltpu.CompilerParams(
    dimension_semantics=("arbitrary",),          # single grid step
    vmem_limit_bytes=32 * 1024 * 1024,
)


def _mha_self(x, mask, params, h):
    B, S, D = x.shape
    wqkv = jnp.concatenate([params['wq'], params['wk'], params['wv']],
                           axis=1).astype(jnp.bfloat16)               # (D, 3D)
    bqkv = jnp.concatenate([params['bq'], params['bk'], params['bv']]
                           ).reshape(1, 3 * D).astype(jnp.float32)     # (1, 3D)
    wo = params['wo'].astype(jnp.bfloat16)
    bo = params['bo'].reshape(1, D).astype(jnp.float32)
    bias = _mask_bias(mask, B, S, S)

    flops = (2 * B * S * D * (3 * D)      # fused QKV projection
             + 4 * B * S * S * D          # scores + context
             + 2 * B * S * D * D)         # output projection
    transc = B * h * S * S
    bytes_acc = int(4 * (x.size + B * S * D) + 2 * bias.size
                    + 2 * (wqkv.size + wo.size) + 4 * (bqkv.size + bo.size))

    call = pl.pallas_call(
        functools.partial(mha_self_attn_kernel, h),
        out_shape=jax.ShapeDtypeStruct((B, S, D), jnp.float32),
        grid=(1,),
        in_specs=[_full((B, S, D)), _full((B, S, S)),
                  _full((D, 3 * D)), _full((1, 3 * D)),
                  _full((D, D)), _full((1, D))],
        out_specs=_full((B, S, D)),
        compiler_params=_COMPILER_PARAMS,
        cost_estimate=pl.CostEstimate(flops=int(flops),
                                      transcendentals=int(transc),
                                      bytes_accessed=bytes_acc),
    )
    return call(x, bias, wqkv, bqkv, wo, bo)


def _mha_general(query, key, value, mask, params, h):
    B, Sq, D = query.shape
    Skv = key.shape[1]
    w = {n: params[n].astype(jnp.bfloat16) for n in ('wq', 'wk', 'wv', 'wo')}
    b = {n: params[n].reshape(1, D).astype(jnp.float32)
         for n in ('bq', 'bk', 'bv', 'bo')}
    bias = _mask_bias(mask, B, Sq, Skv)

    flops = (2 * B * Sq * D * D           # Q projection
             + 4 * B * Skv * D * D        # K, V projections
             + 4 * B * Sq * Skv * D       # scores + context
             + 2 * B * Sq * D * D)        # output projection
    transc = B * h * Sq * Skv
    bytes_acc = int(4 * (query.size + key.size + value.size + B * Sq * D)
                    + 2 * bias.size + 2 * 4 * D * D + 4 * 4 * D)

    call = pl.pallas_call(
        functools.partial(mha_general_kernel, h),
        out_shape=jax.ShapeDtypeStruct((B, Sq, D), jnp.float32),
        grid=(1,),
        in_specs=[_full((B, Sq, D)), _full((B, Skv, D)), _full((B, Skv, D)),
                  _full((B, Sq, Skv)),
                  _full((D, D)), _full((1, D)),
                  _full((D, D)), _full((1, D)),
                  _full((D, D)), _full((1, D)),
                  _full((D, D)), _full((1, D))],
        out_specs=_full((B, Sq, D)),
        compiler_params=_COMPILER_PARAMS,
        cost_estimate=pl.CostEstimate(flops=int(flops),
                                      transcendentals=int(transc),
                                      bytes_accessed=bytes_acc),
    )
    return call(query, key, value, bias,
                w['wq'], b['bq'], w['wk'], b['bk'], w['wv'], b['bv'],
                w['wo'], b['bo'])


def mha_forward(query, key, value, mask, params, h):
    """MultiHeadedAttention.forward(query, key, value, mask) — inference mode."""
    D = query.shape[-1]
    assert D % h == 0
    # TODO(synk): training-mode dropout (p=0.1) on the attention probabilities is
    # the identity here (eval mode); could be added with pltpu.prng_random_bits.
    if query is key and key is value:
        return _mha_self(query, mask, params, h)       # fused-QKV fast path
    return _mha_general(query, key, value, mask, params, h)


# --------------------------- pure-JAX reference -----------------------------
def mha_reference(query, key, value, mask, p, h):
    B, Sq, D = query.shape
    Skv = key.shape[1]
    dk = D // h
    q = query @ p['wq'] + p['bq']
    k = key @ p['wk'] + p['bk']
    v = value @ p['wv'] + p['bv']
    qh = q.reshape(B, Sq, h, dk).transpose(0, 2, 1, 3)
    kh = k.reshape(B, Skv, h, dk).transpose(0, 2, 1, 3)
    vh = v.reshape(B, Skv, h, dk).transpose(0, 2, 1, 3)
    scores = jnp.einsum('bhqd,bhkd->bhqk', qh, kh) / math.sqrt(dk)
    if mask is not None:
        scores = jnp.where(mask[:, None, :, :] == 0, -1e9, scores)
    pr = jax.nn.softmax(scores, axis=-1)
    ctx = jnp.einsum('bhqk,bhkd->bhqd', pr, vh)
    ctx = ctx.transpose(0, 2, 1, 3).reshape(B, Sq, D)
    return ctx @ p['wo'] + p['bo']


# ---------------------------------- main ------------------------------------
if __name__ == "__main__":
    B, S, D, H = 2, 8, 32, 4

    key = jax.random.PRNGKey(0)
    ks = jax.random.split(key, 12)

    def init_w(k, shape, scale=0.05):
        return (scale * jax.random.normal(k, shape)).astype(jnp.float32)

    params = {
        'wq': init_w(ks[0], (D, D)), 'bq': init_w(ks[1], (D,)),
        'wk': init_w(ks[2], (D, D)), 'bk': init_w(ks[3], (D,)),
        'wv': init_w(ks[4], (D, D)), 'bv': init_w(ks[5], (D,)),
        'wo': init_w(ks[6], (D, D)), 'bo': init_w(ks[7], (D,)),
    }

    x = jax.random.normal(ks[8], (B, S, D), dtype=jnp.float32)
    kx = jax.random.normal(ks[9], (B, S, D), dtype=jnp.float32)
    vx = jax.random.normal(ks[10], (B, S, D), dtype=jnp.float32)

    # padding-style mask: batch 0 attends everywhere, batch 1 masks the last
    # two key positions.
    mask = jnp.ones((B, S, S), dtype=jnp.float32)
    mask = mask.at[1, :, S - 2:].set(0.0)

    # self-attention path (fused QKV kernel) — the usage in TG_GGNN
    out_self = jax.block_until_ready(mha_forward(x, x, x, mask, params, H))
    ref_self = mha_reference(x, x, x, mask, params, H)
    np.testing.assert_allclose(np.asarray(out_self), np.asarray(ref_self),
                               rtol=2e-2, atol=2e-2)

    # general path (distinct query / key / value)
    out_gen = jax.block_until_ready(mha_forward(x, kx, vx, mask, params, H))
    ref_gen = mha_reference(x, kx, vx, mask, params, H)
    np.testing.assert_allclose(np.asarray(out_gen), np.asarray(ref_gen),
                               rtol=2e-2, atol=2e-2)

    print("KERNEL_OK")
</pallas_src>

<mosaic_0001>
module attributes {stable_mosaic.version = 11 : i64} {
  func.func @mha_self_attn_kernel(%arg0: i32, %arg1: memref<2x8x32xf32, #tpu.memory_space<vmem>>, %arg2: memref<2x8x8xbf16, #tpu.memory_space<vmem>>, %arg3: memref<32x96xbf16, #tpu.memory_space<vmem>>, %arg4: memref<1x96xf32, #tpu.memory_space<vmem>>, %arg5: memref<32x32xbf16, #tpu.memory_space<vmem>>, %arg6: memref<1x32xf32, #tpu.memory_space<vmem>>, %arg7: memref<2x8x32xf32, #tpu.memory_space<vmem>>) attributes {dimension_semantics = [#tpu.dimension_semantics<arbitrary>], iteration_bounds = array<i64: 1>, scalar_prefetch = 0 : i64, scratch_operands = 0 : i64, tpu.core_type = #tpu.core_type<tc>, window_params = [{pipeline_mode = #tpu.pipeline_mode<synchronous>, transform_indices = @transform_0, window_bounds = array<i64: 2, 8, 32>}, {pipeline_mode = #tpu.pipeline_mode<synchronous>, transform_indices = @transform_1, window_bounds = array<i64: 2, 8, 8>}, {pipeline_mode = #tpu.pipeline_mode<synchronous>, transform_indices = @transform_2, window_bounds = array<i64: 32, 96>}, {pipeline_mode = #tpu.pipeline_mode<synchronous>, transform_indices = @transform_3, window_bounds = array<i64: 1, 96>}, {pipeline_mode = #tpu.pipeline_mode<synchronous>, transform_indices = @transform_4, window_bounds = array<i64: 32, 32>}, {pipeline_mode = #tpu.pipeline_mode<synchronous>, transform_indices = @transform_5, window_bounds = array<i64: 1, 32>}, {pipeline_mode = #tpu.pipeline_mode<synchronous>, transform_indices = @transform_6, window_bounds = array<i64: 2, 8, 32>}]} {
    %c0 = arith.constant 0 : index
    %c0_0 = arith.constant 0 : index
    %c0_1 = arith.constant 0 : index
    %0 = vector.load %arg1[%c0, %c0_0, %c0_1] : memref<2x8x32xf32, #tpu.memory_space<vmem>>, vector<2x8x32xf32>
    %1 = vector.shape_cast %0 : vector<2x8x32xf32> to vector<16x32xf32>
    %2 = arith.truncf %1 : vector<16x32xf32> to vector<16x32xbf16>
    %c0_2 = arith.constant 0 : index
    %c0_3 = arith.constant 0 : index
    %3 = vector.load %arg3[%c0_2, %c0_3] : memref<32x96xbf16, #tpu.memory_space<vmem>>, vector<32x96xbf16>
    %cst = arith.constant dense<0.000000e+00> : vector<16x96xf32>
    %4 = tpu.matmul %2, %3, %cst {dimension_numbers = #tpu.dot_dimension_numbers<[1], [0], [0], [1], [0, 0, 1, 1], [], []>} : vector<16x32xbf16>, vector<32x96xbf16>, vector<16x96xf32> -> vector<16x96xf32>
    %c0_4 = arith.constant 0 : index
    %c0_5 = arith.constant 0 : index
    %5 = vector.load %arg4[%c0_4, %c0_5] : memref<1x96xf32, #tpu.memory_space<vmem>>, vector<1x96xf32>
    %6 = vector.broadcast %5 : vector<1x96xf32> to vector<16x96xf32>
    %7 = arith.addf %4, %6 : vector<16x96xf32>
    %8 = vector.extract_strided_slice %7 {offsets = [0, 0], sizes = [16, 32], strides = [1, 1]} : vector<16x96xf32> to vector<16x32xf32>
    %9 = vector.extract_strided_slice %7 {offsets = [0, 32], sizes = [16, 32], strides = [1, 1]} : vector<16x96xf32> to vector<16x32xf32>
    %10 = vector.extract_strided_slice %7 {offsets = [0, 64], sizes = [16, 32], strides = [1, 1]} : vector<16x96xf32> to vector<16x32xf32>
    %c0_6 = arith.constant 0 : index
    %c0_7 = arith.constant 0 : index
    %c0_8 = arith.constant 0 : index
    %11 = vector.load %arg2[%c0_6, %c0_7, %c0_8] : memref<2x8x8xbf16, #tpu.memory_space<vmem>>, vector<2x8x8xbf16>
    %12 = vector.extract_strided_slice %8 {offsets = [0, 0], sizes = [8, 32], strides = [1, 1]} : vector<16x32xf32> to vector<8x32xf32>
    %13 = vector.shape_cast %12 : vector<8x32xf32> to vector<8x4x8xf32>
    %14 = tpu.transpose %13, [1, 0, 2] : vector<8x4x8xf32> -> vector<4x8x8xf32>
    %15 = vector.extract_strided_slice %9 {offsets = [0, 0], sizes = [8, 32], strides = [1, 1]} : vector<16x32xf32> to vector<8x32xf32>
    %16 = vector.shape_cast %15 : vector<8x32xf32> to vector<8x4x8xf32>
    %17 = tpu.transpose %16, [1, 0, 2] : vector<8x4x8xf32> -> vector<4x8x8xf32>
    %18 = vector.extract_strided_slice %10 {offsets = [0, 0], sizes = [8, 32], strides = [1, 1]} : vector<16x32xf32> to vector<8x32xf32>
    %19 = vector.shape_cast %18 : vector<8x32xf32> to vector<8x4x8xf32>
    %20 = tpu.transpose %19, [1, 0, 2] : vector<8x4x8xf32> -> vector<4x8x8xf32>
    %21 = arith.truncf %14 : vector<4x8x8xf32> to vector<4x8x8xbf16>
    %22 = arith.truncf %17 : vector<4x8x8xf32> to vector<4x8x8xbf16>
    "tpu.trace_start"() <{level = 10 : i32, message = "hqd,hkd->hqk"}> : () -> ()
    %cst_9 = arith.constant dense<0.000000e+00> : vector<4x8x8xf32>
    %23 = tpu.matmul %21, %22, %cst_9 {dimension_numbers = #tpu.dot_dimension_numbers<[2], [2], [1], [1], [0, 0, 0, 1, 1, 1], [0], [0]>} : vector<4x8x8xbf16>, vector<4x8x8xbf16>, vector<4x8x8xf32> -> vector<4x8x8xf32>
    "tpu.trace_stop"() : () -> ()
    %cst_10 = arith.constant 0.353553385 : f32
    %24 = vector.broadcast %cst_10 : f32 to vector<4x8x8xf32>
    %25 = arith.mulf %23, %24 : vector<4x8x8xf32>
    %26 = vector.extract_strided_slice %11 {offsets = [0, 0, 0], sizes = [1, 8, 8], strides = [1, 1, 1]} : vector<2x8x8xbf16> to vector<1x8x8xbf16>
    %27 = vector.shape_cast %26 : vector<1x8x8xbf16> to vector<8x8xbf16>
    %28 = vector.shape_cast %27 : vector<8x8xbf16> to vector<1x8x8xbf16>
    %29 = arith.extf %28 : vector<1x8x8xbf16> to vector<1x8x8xf32>
    %30 = vector.broadcast %29 : vector<1x8x8xf32> to vector<4x8x8xf32>
    %31 = arith.addf %25, %30 : vector<4x8x8xf32>
    %cst_11 = arith.constant dense<0xFF800000> : vector<4x8xf32>
    %32 = vector.multi_reduction <maximumf>, %31, %cst_11 [2] : vector<4x8x8xf32> to vector<4x8xf32>
    %33 = vector.shape_cast %32 : vector<4x8xf32> to vector<4x8x1xf32>
    %34 = vector.broadcast %33 : vector<4x8x1xf32> to vector<4x8x8xf32>
    %35 = arith.subf %31, %34 : vector<4x8x8xf32>
    %36 = math.exp %35 : vector<4x8x8xf32>
    %cst_12 = arith.constant dense<0.000000e+00> : vector<4x8xf32>
    %37 = vector.multi_reduction <add>, %36, %cst_12 [2] : vector<4x8x8xf32> to vector<4x8xf32>
    %38 = vector.shape_cast %37 : vector<4x8xf32> to vector<4x8x1xf32>
    %39 = tpu.reciprocal %38 {approx = true} : vector<4x8x1xf32> -> vector<4x8x1xf32>
    %40 = vector.broadcast %39 : vector<4x8x1xf32> to vector<4x8x8xf32>
    %41 = arith.mulf %36, %40 : vector<4x8x8xf32>
    %42 = arith.truncf %41 : vector<4x8x8xf32> to vector<4x8x8xbf16>
    %43 = arith.truncf %20 : vector<4x8x8xf32> to vector<4x8x8xbf16>
    "tpu.trace_start"() <{level = 10 : i32, message = "hqk,hkd->hqd"}> : () -> ()
    %cst_13 = arith.constant dense<0.000000e+00> : vector<4x8x8xf32>
    %44 = tpu.matmul %42, %43, %cst_13 {dimension_numbers = #tpu.dot_dimension_numbers<[2], [1], [1], [2], [0, 0, 0, 1, 1, 2], [0], [0]>} : vector<4x8x8xbf16>, vector<4x8x8xbf16>, vector<4x8x8xf32> -> vector<4x8x8xf32>
    "tpu.trace_stop"() : () -> ()
    %45 = tpu.transpose %44, [1, 0, 2] : vector<4x8x8xf32> -> vector<8x4x8xf32>
    %46 = vector.shape_cast %45 : vector<8x4x8xf32> to vector<8x32xf32>
    %47 = vector.extract_strided_slice %8 {offsets = [8, 0], sizes = [8, 32], strides = [1, 1]} : vector<16x32xf32> to vector<8x32xf32>
    %48 = vector.shape_cast %47 : vector<8x32xf32> to vector<8x4x8xf32>
    %49 = tpu.transpose %48, [1, 0, 2] : vector<8x4x8xf32> -> vector<4x8x8xf32>
    %50 = vector.extract_strided_slice %9 {offsets = [8, 0], sizes = [8, 32], strides = [1, 1]} : vector<16x32xf32> to vector<8x32xf32>
    %51 = vector.shape_cast %50 : vector<8x32xf32> to vector<8x4x8xf32>
    %52 = tpu.transpose %51, [1, 0, 2] : vector<8x4x8xf32> -> vector<4x8x8xf32>
    %53 = vector.extract_strided_slice %10 {offsets = [8, 0], sizes = [8, 32], strides = [1, 1]} : vector<16x32xf32> to vector<8x32xf32>
    %54 = vector.shape_cast %53 : vector<8x32xf32> to vector<8x4x8xf32>
    %55 = tpu.transpose %54, [1, 0, 2] : vector<8x4x8xf32> -> vector<4x8x8xf32>
    %56 = arith.truncf %49 : vector<4x8x8xf32> to vector<4x8x8xbf16>
    %57 = arith.truncf %52 : vector<4x8x8xf32> to vector<4x8x8xbf16>
    "tpu.trace_start"() <{level = 10 : i32, message = "hqd,hkd->hqk"}> : () -> ()
    %cst_14 = arith.constant dense<0.000000e+00> : vector<4x8x8xf32>
    %58 = tpu.matmul %56, %57, %cst_14 {dimension_numbers = #tpu.dot_dimension_numbers<[2], [2], [1], [1], [0, 0, 0, 1, 1, 1], [0], [0]>} : vector<4x8x8xbf16>, vector<4x8x8xbf16>, vector<4x8x8xf32> -> vector<4x8x8xf32>
    "tpu.trace_stop"() : () -> ()
    %cst_15 = arith.constant 0.353553385 : f32
    %59 = vector.broadcast %cst_15 : f32 to vector<4x8x8xf32>
    %60 = arith.mulf %58, %59 : vector<4x8x8xf32>
    %61 = vector.extract_strided_slice %11 {offsets = [1, 0, 0], sizes = [1, 8, 8], strides = [1, 1, 1]} : vector<2x8x8xbf16> to vector<1x8x8xbf16>
    %62 = vector.shape_cast %61 : vector<1x8x8xbf16> to vector<8x8xbf16>
    %63 = vector.shape_cast %62 : vector<8x8xbf16> to vector<1x8x8xbf16>
    %64 = arith.extf %63 : vector<1x8x8xbf16> to vector<1x8x8xf32>
    %65 = vector.broadcast %64 : vector<1x8x8xf32> to vector<4x8x8xf32>
    %66 = arith.addf %60, %65 : vector<4x8x8xf32>
    %cst_16 = arith.constant dense<0xFF800000> : vector<4x8xf32>
    %67 = vector.multi_reduction <maximumf>, %66, %cst_16 [2] : vector<4x8x8xf32> to vector<4x8xf32>
    %68 = vector.shape_cast %67 : vector<4x8xf32> to vector<4x8x1xf32>
    %69 = vector.broadcast %68 : vector<4x8x1xf32> to vector<4x8x8xf32>
    %70 = arith.subf %66, %69 : vector<4x8x8xf32>
    %71 = math.exp %70 : vector<4x8x8xf32>
    %cst_17 = arith.constant dense<0.000000e+00> : vector<4x8xf32>
    %72 = vector.multi_reduction <add>, %71, %cst_17 [2] : vector<4x8x8xf32> to vector<4x8xf32>
    %73 = vector.shape_cast %72 : vector<4x8xf32> to vector<4x8x1xf32>
    %74 = tpu.reciprocal %73 {approx = true} : vector<4x8x1xf32> -> vector<4x8x1xf32>
    %75 = vector.broadcast %74 : vector<4x8x1xf32> to vector<4x8x8xf32>
    %76 = arith.mulf %71, %75 : vector<4x8x8xf32>
    %77 = arith.truncf %76 : vector<4x8x8xf32> to vector<4x8x8xbf16>
    %78 = arith.truncf %55 : vector<4x8x8xf32> to vector<4x8x8xbf16>
    "tpu.trace_start"() <{level = 10 : i32, message = "hqk,hkd->hqd"}> : () -> ()
    %cst_18 = arith.constant dense<0.000000e+00> : vector<4x8x8xf32>
    %79 = tpu.matmul %77, %78, %cst_18 {dimension_numbers = #tpu.dot_dimension_numbers<[2], [1], [1], [2], [0, 0, 0, 1, 1, 2], [0], [0]>} : vector<4x8x8xbf16>, vector<4x8x8xbf16>, vector<4x8x8xf32> -> vector<4x8x8xf32>
    "tpu.trace_stop"() : () -> ()
    %80 = tpu.transpose %79, [1, 0, 2] : vector<4x8x8xf32> -> vector<8x4x8xf32>
    %81 = vector.shape_cast %80 : vector<8x4x8xf32> to vector<8x32xf32>
    %82 = tpu.concatenate %46, %81 in 0 : vector<8x32xf32>, vector<8x32xf32> -> vector<16x32xf32>
    %83 = arith.truncf %82 : vector<16x32xf32> to vector<16x32xbf16>
    %c0_19 = arith.constant 0 : index
    %c0_20 = arith.constant 0 : index
    %84 = vector.load %arg5[%c0_19, %c0_20] : memref<32x32xbf16, #tpu.memory_space<vmem>>, vector<32x32xbf16>
    %cst_21 = arith.constant dense<0.000000e+00> : vector<16x32xf32>
    %85 = tpu.matmul %83, %84, %cst_21 {dimension_numbers = #tpu.dot_dimension_numbers<[1], [0], [0], [1], [0, 0, 1, 1], [], []>} : vector<16x32xbf16>, vector<32x32xbf16>, vector<16x32xf32> -> vector<16x32xf32>
    %c0_22 = arith.constant 0 : index
    %c0_23 = arith.constant 0 : index
    %86 = vector.load %arg6[%c0_22, %c0_23] : memref<1x32xf32, #tpu.memory_space<vmem>>, vector<1x32xf32>
    %87 = vector.broadcast %86 : vector<1x32xf32> to vector<16x32xf32>
    %88 = arith.addf %85, %87 : vector<16x32xf32>
    %89 = vector.shape_cast %88 : vector<16x32xf32> to vector<2x8x32xf32>
    %c0_24 = arith.constant 0 : index
    %c0_25 = arith.constant 0 : index
    %c0_26 = arith.constant 0 : index
    %90 = vector.load %arg7[%c0_24, %c0_25, %c0_26] : memref<2x8x32xf32, #tpu.memory_space<vmem>>, vector<2x8x32xf32>
    tpu.vector_store %arg7[%c0_24, %c0_25, %c0_26], %89 {strides = array<i32>} : memref<2x8x32xf32, #tpu.memory_space<vmem>>, vector<2x8x32xf32>,
    return
  }
  func.func @transform_0(%arg0: i32) -> (i32, i32, i32) {
    %c0_i32 = arith.constant 0 : i32
    %c0_i32_0 = arith.constant 0 : i32
    %c0_i32_1 = arith.constant 0 : i32
    %c0_i32_2 = arith.constant 0 : i32
    return %c0_i32, %c0_i32_0, %c0_i32_1 : i32, i32, i32
  }
  func.func @transform_1(%arg0: i32) -> (i32, i32, i32) {
    %c0_i32 = arith.constant 0 : i32
    %c0_i32_0 = arith.constant 0 : i32
    %c0_i32_1 = arith.constant 0 : i32
    %c0_i32_2 = arith.constant 0 : i32
    return %c0_i32, %c0_i32_0, %c0_i32_1 : i32, i32, i32
  }
  func.func @transform_2(%arg0: i32) -> (i32, i32) {
    %c0_i32 = arith.constant 0 : i32
    %c0_i32_0 = arith.constant 0 : i32
    %c0_i32_1 = arith.constant 0 : i32
    return %c0_i32, %c0_i32_0 : i32, i32
  }
  func.func @transform_3(%arg0: i32) -> (i32, i32) {
    %c0_i32 = arith.constant 0 : i32
    %c0_i32_0 = arith.constant 0 : i32
    %c0_i32_1 = arith.constant 0 : i32
    return %c0_i32, %c0_i32_0 : i32, i32
  }
  func.func @transform_4(%arg0: i32) -> (i32, i32) {
    %c0_i32 = arith.constant 0 : i32
    %c0_i32_0 = arith.constant 0 : i32
    %c0_i32_1 = arith.constant 0 : i32
    return %c0_i32, %c0_i32_0 : i32, i32
  }
  func.func @transform_5(%arg0: i32) -> (i32, i32) {
    %c0_i32 = arith.constant 0 : i32
    %c0_i32_0 = arith.constant 0 : i32
    %c0_i32_1 = arith.constant 0 : i32
    return %c0_i32, %c0_i32_0 : i32, i32
  }
  func.func @transform_6(%arg0: i32) -> (i32, i32, i32) {
    %c0_i32 = arith.constant 0 : i32
    %c0_i32_0 = arith.constant 0 : i32
    %c0_i32_1 = arith.constant 0 : i32
    %c0_i32_2 = arith.constant 0 : i32
    return %c0_i32, %c0_i32_0, %c0_i32_1 : i32, i32, i32
  }
}

</mosaic_0001>

<bundles_post_ra>
// kernel: tpu_custom_call.1
= control target key start
LH: loop header
LB: loop body
LE: loop exit
PB: predicated region body
PF: predicated region fallthrough
CT: control target
= control target key end

     0   :  { %11 = vsyncpa [#allocation3], 0  ;;  %s2490_s0 = inlined_call_operand.hbm [shape: f32[2,8,32], index: 0, kind: input, shape index: {}]   ;;  %s2491_s1 = inlined_call_operand.hbm [shape: bf16[2,8,8], index: 1, kind: input, shape index: {}]   ;;  %s2492_s2 = inlined_call_operand.hbm [shape: bf16[32,96], index: 2, kind: input, shape index: {}]   ;;  %s2493_s3 = inlined_call_operand.vmem [shape: f32[1,96], index: 3, kind: input, shape index: {}]   ;;  %s2494_s4 = inlined_call_operand.hbm [shape: bf16[32,32], index: 4, kind: input, shape index: {}]   ;;  %s2495_s5 = inlined_call_operand.vmem [shape: f32[1,32], index: 5, kind: input, shape index: {}]   ;;  %s2496_s6 = inlined_call_operand.hbm [shape: f32[2,8,32], index: 6, kind: output, shape index: {}]  }
   0x1   :  { %12 = vsyncpa [#allocation6], 0 }
   0x2   :  { %13 = vsyncpa [#allocation9], 0  ;;  %s32_s23 = sshll.u32 %s2491_s1, 4  ;;  %s33_s23 = int_to_ptr.hbm [resolvable:$true] %s32_s23 }
   0x3   :  { %14 = vsyncpa [#allocation4], 0  ;;  %s1893_s24 = smov [#allocation5]   ;;  %s19_s28 = sshll.u32 %s2490_s0, 4  ;;  %s20_s28 = int_to_ptr.hbm [resolvable:$true] %s19_s28 }
   0x4   :  { %s34_s25 = sshll.u32 %s1893_s24, 4  ;;  %s1894_s29 = smov 64   ;;  %s35_s25 = int_to_ptr.vmem [resolvable:$true] %s34_s25 }
   0x5   :  { %s1895_s30 = smov 4   ;;  %s1896_s7 = smov [#allocation2]  }
   0x6   :  { %40 = dma.hbm_to_vmem [thread:$0]  %s33_s23, 128, %s35_s25, [#allocation6], %s1894_s29, %s1894_s29, %s1895_s30  }
   0x7   :  { %s21_s8 = sshll.u32 %s1896_s7, 4  ;;  %s1897_s9 = smov 128   ;;  %s22_s8 = int_to_ptr.vmem [resolvable:$true] %s21_s8 }
   0x8   :  { %s1898_s1 = smov 8   ;;  %s45_s12 = sshll.u32 %s2492_s2, 4  ;;  %s46_s12 = int_to_ptr.hbm [resolvable:$true] %s45_s12 }
   0x9   :  { %27 = dma.hbm_to_vmem [thread:$0]  %s20_s28, 256, %s22_s8, [#allocation3], %s1897_s9, %s1897_s9, %s1898_s1  }
   0xa   :  { %s1899_s0 = smov [#allocation7]   ;;  %s60_s16 = sshll.u32 %s2494_s4, 4  ;;  %s61_s16 = int_to_ptr.hbm [resolvable:$true] %s60_s16 }
   0xb   :  { %s47_s13 = sshll.u32 %s1899_s0, 4  ;;  %s1900_s17 = smov [#allocation8]   ;;  %s48_s13 = int_to_ptr.vmem [resolvable:$true] %s47_s13 }
   0xc   :  { %53 = dma.hbm_to_vmem [thread:$0]  %s46_s12, 256, %s48_s13, [#allocation6], %s1894_s29, %s1894_s29, %s1895_s30  }
   0xd   :  { %s62_s18 = sshll.u32 %s1900_s17, 4  ;;  %s63_s18 = int_to_ptr.vmem [resolvable:$true] %s62_s18 }
   0xe   :  { %68 = dma.hbm_to_vmem [thread:$0]  %s61_s16, 256, %s63_s18, [#allocation9], %s1894_s29, %s1894_s29, %s1895_s30  }
   0xf   :  { %1885 = dma.done.wait [#allocation3], 256  }
  0x10   :  { %1886 = vsyncadd [#allocation3], 4294967040 }
  0x11   :  { %1887 = dma.done.wait [#allocation6], 384  }
  0x12   :  { %1888 = vsyncadd [#allocation6], 4294966912 }
  0x13   :  { %1889 = dma.done.wait [#allocation9], 256  }
  0x14   :  { %1890 = vsyncadd [#allocation9], 4294967040  ;;  %v1652_v0 = vld [vmem:[#allocation7 + $0x8] sm:$0xff]  ;;  %v1651_v1 = vld [vmem:[#allocation7] sm:$0xff]  ;;  %vm111_vm0 = vcmask 261120   ;;  %s1901_s19 = smov 104  }
  0x15   :  { %121 = vmatpush.bf16.msra.mxu0 %v1652_v0  ;;  %v88_v2 = vld [vmem:[#allocation2] sm:$0xff]  ;;  %v89_v3 = vld [vmem:[#allocation2 + $0x8] sm:$0xff]  ;;  %s1902_s20 = smov 120   ;;  %s1903_s21 = smov 112   ;;  %v1905_v15 = vmov 1983009808  }
  0x16   :  { %v90_v4 = vpack.c.bf16 %v89_v3, %v88_v2  ;;  %v1731_v5 = vld [vmem:[%s2493_s3] ss:$0 sm:$0xff]  ;;  %s1904_s22 = smov 96   ;;  %v147_v16 = vunpack.c.l.s4 %v1905_v15  ;;  %vm142_vm1 = vcmask 1047556   ;;  %v1906_v29 = vmov 1934713408  }
  0x17   :  { %v171_v30 = vunpack.c.l.s4 %v1906_v29  ;;  %vm504_vm2 = vcmask 64512   ;;  %vm645_vm3 = vcmask 1043456   ;;  %s1907_s3 = smov 16   ;;  %s1908_s23 = smov 24   ;;  %vm842_vm4 = vcmask 130048  }
  0x18   :  { %v1982_v20 = vunpack.c.0.s8 %v147_v16  ;;  %vm844_vm5 = vcmask 195584   ;;  %s1909_s26 = smov [#allocation10]   ;;  %s1602_s30 = sshll.u32 %s2496_s6, 4  ;;  %s1603_s30 = int_to_ptr.hbm [resolvable:$true] %s1602_s30 }
  0x19   :  { %122 = vmatpush.bf16.msra.mxu0 %v1651_v1  ;;  %v1992_v35 = vunpack.c.0.s8 %v171_v30  ;;  %s1600_s27 = sshll.u32 %s1909_s26, 4  ;;  %s1601_s27 = int_to_ptr.vmem [resolvable:$true] %s1600_s27 }
  0x1c   :  { %1625 = vmatmul.msk.bf16.vlgmr.msra.gmra.mxu0 %vm111_vm0, %v90_v4 }
  0x99   :  { %v124_v6 = vpop.f32.mrf.mxu0 }
  0x9a   :  { %v125_v7 = vadd.f32 %v1731_v5, %v124_v6 }
  0x9c   :  { %138 = vrot.lane.b32.xlu1 %v125_v7, %s1901_s19  ;;  %132 = vrot.lane.b32.xlu0 %v125_v7, %s1902_s20  ;;  %v144_v18 = vrot.slane %v125_v7, 4 }
  0xa1   :  { %v126_v10 = vpop.f32.mrf.mxu0 }
  0xa2   :  { %v1974_v13 = vadd.f32 %v1731_v5, %v126_v10 }
  0xa4   :  { %135 = vrot.lane.b32.xlu0 %v125_v7, %s1903_s21 }
 0x10e   :  { %v133_v8 = vpop.permute.xlu0 %132  ;;  %v139_v11 = vpop.permute.xlu1 %138 }
 0x10f   :  { %v1970_v9 = vpack.i.bf16 %v133_v8, %v125_v7  ;;  %v156_v21 = vrot.slane %v133_v8, 4  ;;  %v154_v24 = vrot.slane %v139_v11, 4 }
 0x111   :  { %1677 = vrot.lane.b32.xlu1 %v1970_v9, %s1904_s22  ;;  %v157_v26 = vsel %vm142_vm1, %v139_v11, %v156_v21  ;;  %v155_v28 = vsel %vm142_vm1, %v154_v24, %v133_v8 }
 0x112   :  { %v165_v31 = vperm.slane %v157_v26, %v1982_v20  ;;  %v161_v33 = vperm.slane %v155_v28, %v1982_v20 }
 0x114   :  { %v178_v38 = vrot.slane %v165_v31, 4  ;;  %v166_v40 = vrot.slane %v161_v33, 4 }
 0x116   :  { %v136_v12 = vpop.permute.xlu0 %135 }
 0x117   :  { %v1691_v14 = vpack.i.bf16 %v139_v11, %v136_v12  ;;  %v141_v17 = vrot.slane %v136_v12, 4  ;;  %v145_v19 = vsel %vm142_vm1, %v136_v12, %v144_v18 }
 0x118   :  { %v153_v23 = vperm.slane %v145_v19, %v1982_v20 }
 0x119   :  { %847 = vrot.lane.b32.xlu1 %v1974_v13, %s1902_s20  ;;  %1692 = vrot.lane.b32.xlu0 %v1691_v14, %s1894_s29  ;;  %v143_v22 = vsel %vm142_vm1, %v141_v17, %v125_v7 }
 0x11a   :  { %1682 = vrot.lane.b32.xlu2 %v1691_v14, %s1904_s22  ;;  %v149_v25 = vperm.slane %v143_v22, %v1982_v20  ;;  %v180_v27 = vrot.slane %v153_v23, 4  ;;  %v179_v41 = vsel %vm142_vm1, %v178_v38, %v153_v23 }
 0x11b   :  { %v185_v44 = vperm.slane %v179_v41, %v1992_v35 }
 0x11c   :  { %v168_v32 = vrot.slane %v149_v25, 4  ;;  %v181_v34 = vsel %vm142_vm1, %v165_v31, %v180_v27  ;;  %v167_v43 = vsel %vm142_vm1, %v166_v40, %v149_v25 }
 0x11d   :  { %v189_v37 = vperm.slane %v181_v34, %v1992_v35  ;;  %v173_v46 = vperm.slane %v167_v43, %v1992_v35  ;;  %v194_v49 = vrot.slane %v185_v44, 4 }
 0x11e   :  { %v169_v36 = vsel %vm142_vm1, %v161_v33, %v168_v32 }
 0x11f   :  { %v177_v39 = vperm.slane %v169_v36, %v1992_v35  ;;  %v196_v42 = vrot.slane %v189_v37, 4  ;;  %v190_v52 = vrot.slane %v173_v46, 4  ;;  %v195_v56 = vsel %vm142_vm1, 0.0, %v194_v49 }
 0x121   :  { %850 = vrot.lane.b32.xlu1 %v1974_v13, %s1903_s21  ;;  %v192_v45 = vrot.slane %v177_v39, 4  ;;  %v197_v47 = vsel %vm142_vm1, 0.0, %v196_v42  ;;  %v209_v50 = vsel %vm142_vm1, %v196_v42, %v185_v44  ;;  %v191_v61 = vsel %vm142_vm1, 0.0, %v190_v52 }
 0x122   :  { %v214_v51 = vrot.slane %v197_v47, 4  ;;  %v213_v57 = vperm.slane %v209_v50, %v1982_v20 }
 0x123   :  { %v193_v48 = vsel %vm142_vm1, 0.0, %v192_v45  ;;  %v198_v54 = vsel %vm142_vm1, %v192_v45, %v173_v46  ;;  %v858_v45 = vrot.slane %v1974_v13, 4 }
 0x124   :  { %v203_v55 = vrot.slane %v193_v48, 4  ;;  %v215_v58 = vsel %vm142_vm1, %v214_v51, %v195_v56  ;;  %v202_v62 = vperm.slane %v198_v54, %v1982_v20  ;;  %v234_v2 = vrot.slane %v213_v57, 4 }
 0x125   :  { %v219_v1 = vperm.slane %v215_v58, %v1982_v20 }
 0x126   :  { %v204_v63 = vsel %vm142_vm1, %v203_v55, %v191_v61  ;;  %v222_v8 = vrot.slane %v202_v62, 4 }
 0x127   :  { %v208_v7 = vperm.slane %v204_v63, %v1982_v20  ;;  %v235_v19 = vsel %vm142_vm1, %v219_v1, %v234_v2  ;;  %v232_v21 = vrot.slane %v219_v1, 4 }
 0x128   :  { %v243_v34 = vperm.slane %v235_v19, %v1992_v35 }
 0x129   :  { %853 = vrot.lane.b32.xlu1 %v1974_v13, %s1901_s19  ;;  %v223_v26 = vsel %vm142_vm1, %v208_v7, %v222_v8  ;;  %v233_v36 = vsel %vm142_vm1, %v232_v21, %v213_v57  ;;  %v220_v40 = vrot.slane %v208_v7, 4 }
 0x12a   :  { %v231_v39 = vperm.slane %v223_v26, %v1992_v35  ;;  %v2038_v46 = vperm.slane %v233_v36, %v1992_v35  ;;  %v248_v50 = vrot.slane %v243_v34, 4 }
 0x12b   :  { %v221_v54 = vsel %vm142_vm1, %v220_v40, %v202_v62 }
 0x12c   :  { %v2059_v7 = vperm.slane %v221_v54, %v1992_v35 }
 0x12e   :  { %v246_v26 = vrot.slane %v2059_v7, 4 }
 0x174   :  { %v1683_v53 = vpop.permute.xlu2 %1682 }
 0x175   :  { %v1685_v59 = vunpack.i.h.bf16 %v1683_v53  ;;  %v1684_v60 = vunpack.i.l.bf16 %v1683_v53  ;;  %v250_v53 = vrot.slane %v231_v39, 4 }
 0x177   :  { %v276_v3 = vrot.slane %v1685_v59, 4  ;;  %v264_v4 = vrot.slane %v1684_v60, 4 }
 0x183   :  { %v1678_v0 = vpop.permute.xlu1 %1677 }
 0x184   :  { %v1680_v5 = vunpack.i.h.bf16 %v1678_v0  ;;  %v1679_v6 = vunpack.i.l.bf16 %v1678_v0 }
 0x186   :  { %v278_v10 = vrot.slane %v1680_v5, 4  ;;  %v265_v11 = vsel %vm142_vm1, %v264_v4, %v1679_v6  ;;  %v266_v12 = vrot.slane %v1679_v6, 4  ;;  %v277_v14 = vsel %vm142_vm1, %v276_v3, %v1680_v5 }
 0x187   :  { %v271_v15 = vperm.slane %v265_v11, %v1982_v20  ;;  %v283_v16 = vperm.slane %v277_v14, %v1982_v20 }
 0x188   :  { %v267_v17 = vsel %vm142_vm1, %v1684_v60, %v266_v12  ;;  %v279_v18 = vsel %vm142_vm1, %v1685_v59, %v278_v10 }
 0x189   :  { %v275_v22 = vperm.slane %v267_v17, %v1982_v20  ;;  %v287_v23 = vperm.slane %v279_v18, %v1982_v20  ;;  %v288_v24 = vrot.slane %v283_v16, 4  ;;  %v290_v25 = vrot.slane %v271_v15, 4 }
 0x18a   :  { %v244_v17 = vrot.slane %v2038_v46, 4 }
 0x18b   :  { %v289_v27 = vsel %vm142_vm1, %v288_v24, %v271_v15  ;;  %v291_v28 = vsel %vm142_vm1, %v283_v16, %v290_v25  ;;  %v300_v29 = vrot.slane %v287_v23, 4  ;;  %v302_v30 = vrot.slane %v275_v22, 4  ;;  %v2025_v31 = vpop.permute.xlu1 %847 }
 0x18c   :  { %v295_v32 = vperm.slane %v289_v27, %v1992_v35  ;;  %v299_v33 = vperm.slane %v291_v28, %v1992_v35  ;;  %v2067_v15 = vsel %vm142_vm1, %v243_v34, %v250_v53  ;;  %v2070_v16 = vsel %vm142_vm1, %v248_v50, %v231_v39 }
 0x18d   :  { %v301_v37 = vsel %vm142_vm1, %v300_v29, %v275_v22  ;;  %v303_v38 = vsel %vm142_vm1, %v287_v23, %v302_v30  ;;  %v870_v27 = vrot.slane %v2025_v31, 4 }
 0x18e   :  { %v307_v41 = vperm.slane %v301_v37, %v1992_v35  ;;  %v311_v42 = vperm.slane %v303_v38, %v1992_v35  ;;  %v312_v43 = vrot.slane %v295_v32, 4  ;;  %v314_v44 = vrot.slane %v299_v33, 4 }
 0x190   :  { %v315_v47 = vsel %vm142_vm1, 0.0, %v314_v44  ;;  %v316_v48 = vrot.slane %v307_v41, 4  ;;  %v318_v49 = vrot.slane %v311_v42, 4  ;;  %v320_v51 = vsel %vm142_vm1, %v314_v44, %v295_v32 }
 0x191   :  { %v325_v52 = vrot.slane %v315_v47, 4  ;;  %v313_v55 = vsel %vm142_vm1, 0.0, %v312_v43  ;;  %v324_v57 = vperm.slane %v320_v51, %v1982_v20 }
 0x192   :  { %v319_v56 = vsel %vm142_vm1, 0.0, %v318_v49  ;;  %v331_v58 = vsel %vm142_vm1, %v318_v49, %v307_v41  ;;  %v317_v61 = vsel %vm142_vm1, 0.0, %v316_v48 }
 0x193   :  { %v336_v59 = vrot.slane %v319_v56, 4  ;;  %v2047_v60 = vpop.permute.xlu1 %850  ;;  %v326_v63 = vsel %vm142_vm1, %v325_v52, %v313_v55  ;;  %v335_v0 = vperm.slane %v331_v58, %v1982_v20  ;;  %v344_v3 = vrot.slane %v324_v57, 4 }
 0x194   :  { %v856_v1 = vrot.slane %v2047_v60, 4  ;;  %v859_v62 = vsel %vm142_vm1, %v2047_v60, %v858_v45  ;;  %v330_v2 = vperm.slane %v326_v63, %v1982_v20  ;;  %v247_v63 = vsel %vm142_vm1, %v2038_v46, %v246_v26 }
 0x195   :  { %v867_v4 = vperm.slane %v859_v62, %v1982_v20  ;;  %v337_v5 = vsel %vm142_vm1, %v336_v59, %v317_v61  ;;  %v356_v6 = vrot.slane %v335_v0, 4 }
 0x196   :  { %v857_v8 = vsel %vm142_vm1, %v856_v1, %v1974_v13  ;;  %v341_v10 = vperm.slane %v337_v5, %v1982_v20  ;;  %v345_v11 = vsel %vm142_vm1, %v330_v2, %v344_v3  ;;  %v342_v12 = vrot.slane %v330_v2, 4 }
 0x197   :  { %v353_v14 = vperm.slane %v345_v11, %v1992_v35  ;;  %v863_v18 = vperm.slane %v857_v8, %v1982_v20  ;;  %v894_v28 = vrot.slane %v867_v4, 4  ;;  %v499_v5 = vpack.c.bf16 %v2067_v15, %v2067_v15 }
 0x198   :  { %v357_v19 = vsel %vm142_vm1, %v341_v10, %v356_v6  ;;  %v343_v21 = vsel %vm142_vm1, %v342_v12, %v324_v57  ;;  %v354_v22 = vrot.slane %v341_v10, 4 }
 0x199   :  { %v365_v23 = vperm.slane %v357_v19, %v1992_v35  ;;  %v372_v24 = vrot.slane %v353_v14, 4  ;;  %v349_v25 = vperm.slane %v343_v21, %v1992_v35  ;;  %v882_v37 = vrot.slane %v863_v18, 4 }
 0x19a   :  { %v355_v29 = vsel %vm142_vm1, %v354_v22, %v335_v0 }
 0x19b   :  { %v2081_v30 = vpop.permute.xlu1 %853  ;;  %v373_v32 = vsel %vm142_vm1, %v365_v23, %v372_v24  ;;  %v361_v33 = vperm.slane %v355_v29, %v1992_v35  ;;  %v368_v34 = vrot.slane %v349_v25, 4  ;;  %v370_v36 = vrot.slane %v365_v23, 4 }
 0x19c   :  { %v868_v38 = vrot.slane %v2081_v30, 4  ;;  %v871_v39 = vsel %vm142_vm1, %v2081_v30, %v870_v27  ;;  %v503_v40 = vpack.c.bf16 %v373_v32, %v373_v32 }
 0x19d   :  { %v879_v41 = vperm.slane %v871_v39, %v1982_v20  ;;  %v369_v42 = vsel %vm142_vm1, %v361_v33, %v368_v34  ;;  %v371_v43 = vsel %vm142_vm1, %v370_v36, %v353_v14  ;;  %v366_v44 = vrot.slane %v361_v33, 4 }
 0x19e   :  { %v869_v45 = vsel %vm142_vm1, %v868_v38, %v2025_v31  ;;  %v566_v47 = vsel %vm504_vm2, %v503_v40, 0  ;;  %v501_v48 = vpack.c.bf16 %v369_v42, %v369_v42  ;;  %v502_v49 = vpack.c.bf16 %v371_v43, %v371_v43 }
 0x19f   :  { %v875_v50 = vperm.slane %v869_v45, %v1982_v20  ;;  %v892_v51 = vrot.slane %v879_v41, 4  ;;  %v895_v52 = vsel %vm142_vm1, %v879_v41, %v894_v28  ;;  %575 = vmatpush.bf16.xpose.msrb.mxu0 %v566_v47  ;;  %v367_v53 = vsel %vm142_vm1, %v366_v44, %v349_v25 }
 0x1a0   :  { %v903_v54 = vperm.slane %v895_v52, %v1992_v35  ;;  %v528_v55 = vsel %vm504_vm2, %v501_v48, 0  ;;  %v547_v56 = vsel %vm504_vm2, %v502_v49, 0  ;;  %v500_v57 = vpack.c.bf16 %v367_v53, %v367_v53  ;;  %v2151_v53 = vld [vmem:[#allocation5] sm:$0xff]  }
 0x1a1   :  { %v880_v58 = vrot.slane %v875_v50, 4  ;;  %v883_v59 = vsel %vm142_vm1, %v875_v50, %v882_v37  ;;  %v893_v61 = vsel %vm142_vm1, %v892_v51, %v867_v4  ;;  %537 = vmatpush.bf16.xpose.msra.mxu2 %v528_v55  ;;  %556 = vmatpush.bf16.xpose.msra.mxu3 %v547_v56  ;;  %v498_v4 = vpack.c.bf16 %v2070_v16, %v2070_v16 }
 0x1a2   :  { %v891_v0 = vperm.slane %v883_v59, %v1992_v35  ;;  %v899_v1 = vperm.slane %v893_v61, %v1992_v35  ;;  %v910_v62 = vrot.slane %v903_v54, 4  ;;  %v509_v2 = vsel %vm504_vm2, %v500_v57, 0 }
 0x1a3   :  { %v881_v3 = vsel %vm142_vm1, %v880_v58, %v863_v18  ;;  %518 = vmatpush.bf16.xpose.msra.mxu1 %v509_v2  ;;  %v497_v14 = vpack.c.bf16 %v247_v63, %v247_v63  ;;  %v245_v18 = vsel %vm142_vm1, %v244_v17, %v2059_v7  ;;  %v1657_v54 = vunpack.c.l.bf16 %v2151_v53 }
 0x1a4   :  { %v887_v6 = vperm.slane %v881_v3, %v1992_v35  ;;  %v906_v8 = vrot.slane %v891_v0, 4  ;;  %v908_v46 = vrot.slane %v899_v1, 4  ;;  %v911_v10 = vsel %vm142_vm1, 0.0, %v910_v62 }
 0x1a5   :  { %v923_v11 = vsel %vm142_vm1, %v910_v62, %v899_v1  ;;  %v928_v12 = vrot.slane %v911_v10, 4  ;;  %v496_v17 = vpack.c.bf16 %v245_v18, %v245_v18  ;;  %v2168_v18 = vpack.i.bf16 %v2081_v30, %v2047_v60 }
 0x1a6   :  { %v904_v19 = vrot.slane %v887_v6, 4  ;;  %v907_v21 = vsel %vm142_vm1, 0.0, %v906_v8  ;;  %v909_v15 = vsel %vm142_vm1, 0.0, %v908_v46  ;;  %v912_v16 = vsel %vm142_vm1, %v906_v8, %v887_v6  ;;  %1629 = vmatmul.msk.bf16.vlgmr.msrb.gmra.mxu0 %vm504_vm2, %v499_v5 }
 0x1a7   :  { %v917_v22 = vrot.slane %v907_v21, 4  ;;  %v927_v23 = vperm.slane %v923_v11, %v1982_v20  ;;  %v929_v24 = vsel %vm142_vm1, %v928_v12, %v909_v15  ;;  %v916_v25 = vperm.slane %v912_v16, %v1982_v20 }
 0x1a8   :  { %v905_v26 = vsel %vm142_vm1, 0.0, %v904_v19  ;;  %v933_v7 = vperm.slane %v929_v24, %v1982_v20  ;;  %1627 = vmatmul.msk.bf16.vlgmr.msra.gmra.mxu2 %vm504_vm2, %v497_v14  ;;  %1628 = vmatmul.msk.bf16.vlgmr.msra.gmra.mxu3 %vm504_vm2, %v498_v4  ;;  %v2160_v14 = vpack.i.bf16 %v2025_v31, %v1974_v13  ;;  %v1693_v19 = vpop.permute.xlu0 %1692 }
 0x1a9   :  { %v918_v27 = vsel %vm142_vm1, %v917_v22, %v905_v26  ;;  %v948_v28 = vrot.slane %v927_v23, 4  ;;  %v936_v29 = vrot.slane %v916_v25, 4 }
 0x1aa   :  { %v946_v32 = vrot.slane %v933_v7, 4  ;;  %1626 = vmatmul.msk.bf16.vlgmr.msra.gmra.mxu1 %vm504_vm2, %v496_v17  ;;  %v922_v33 = vperm.slane %v918_v27, %v1982_v20  ;;  %v1694_v17 = vunpack.i.l.bf16 %v1693_v19 }
 0x1ab   :  { %v949_v34 = vsel %vm142_vm1, %v933_v7, %v948_v28  ;;  %v1695_v7 = vunpack.i.h.bf16 %v1693_v19 }
 0x1ac   :  { %v934_v36 = vrot.slane %v922_v33, 4  ;;  %v947_v37 = vsel %vm142_vm1, %v946_v32, %v927_v23  ;;  %v937_v38 = vsel %vm142_vm1, %v922_v33, %v936_v29  ;;  %v957_v39 = vperm.slane %v949_v34, %v1992_v35 }
 0x1ad   :  { %v953_v40 = vperm.slane %v947_v37, %v1992_v35  ;;  %v945_v41 = vperm.slane %v937_v38, %v1992_v35  ;;  %v398_v27 = vrot.slane %v1695_v7, 4  ;;  %v386_v32 = vrot.slane %v1694_v17, 4 }
 0x1ae   :  { %v935_v42 = vsel %vm142_vm1, %v934_v36, %v916_v25  ;;  %v962_v43 = vrot.slane %v957_v39, 4 }
 0x1af   :  { %v941_v44 = vperm.slane %v935_v42, %v1992_v35  ;;  %v958_v45 = vrot.slane %v953_v40, 4  ;;  %v964_v47 = vrot.slane %v945_v41, 4 }
 0x1b0   :  { %v2140_v48 = vsel %vm142_vm1, %v962_v43, %v945_v41 }
 0x1b1   :  { %v2143_v49 = vsel %vm142_vm1, %v958_v45, %v941_v44  ;;  %v960_v50 = vrot.slane %v941_v44, 4  ;;  %v2146_v51 = vsel %vm142_vm1, %v957_v39, %v964_v47 }
 0x1b3   :  { %v2149_v52 = vsel %vm142_vm1, %v953_v40, %v960_v50 }
 0x223   :  { %v577_v55 = vpop.f32.mrf.mxu0 }
 0x224   :  { %v584_v56 = vmul.f32 0.35355338, %v577_v55 }
 0x226   :  { %v589_v57 = vadd.f32 %v1657_v54, %v584_v56 }
 0x227   :  { %v520_v58 = vpop.f32.mrf.mxu1 }
 0x228   :  { %v581_v59 = vmul.f32 0.35355338, %v520_v58  ;;  %v599_v61 = vsel %vm504_vm2, %v589_v57, -inf }
 0x229   :  { %600 = vmax.xlane.f32.xlu2 %v599_v61 }
 0x22a   :  { %v586_v63 = vadd.f32 %v1657_v54, %v581_v59 }
 0x22b   :  { %v539_v0 = vpop.f32.mrf.mxu2  ;;  %v558_v1 = vpop.f32.mrf.mxu3 }
 0x22c   :  { %v582_v62 = vmul.f32 0.35355338, %v539_v0  ;;  %v583_v2 = vmul.f32 0.35355338, %v558_v1  ;;  %v579_v3 = vpop.f32.mrf.mxu0  ;;  %v590_v5 = vsel %vm504_vm2, %v586_v63, -inf }
 0x22d   :  { %591 = vmax.xlane.f32.xlu1 %v590_v5 }
 0x22e   :  { %v588_v4 = vadd.f32 %v1657_v54, %v583_v2  ;;  %v587_v6 = vadd.f32 %v1657_v54, %v582_v62 }
 0x22f   :  { %v522_v8 = vpop.f32.mrf.mxu1 }
 0x230   :  { %v596_v46 = vsel %vm504_vm2, %v588_v4, -inf  ;;  %v593_v10 = vsel %vm504_vm2, %v587_v6, -inf }
 0x231   :  { %597 = vmax.xlane.f32.xlu2 %v596_v46  ;;  %594 = vmax.xlane.f32.xlu0 %v593_v10 }
 0x233   :  { %v541_v11 = vpop.f32.mrf.mxu2  ;;  %v560_v12 = vpop.f32.mrf.mxu3 }
 0x245   :  { %1697 = vrot.lane.b32.xlu0 %v2160_v14, %s1904_s22 }
 0x249   :  { %1687 = vrot.lane.b32.xlu2 %v1970_v9, %s1894_s29 }
 0x251   :  { %1702 = vrot.lane.b32.xlu2 %v2168_v18, %s1904_s22 }
 0x29c   :  { %v601_v21 = vpop.xlane.xlu2 %600 }
 0x29d   :  { %v605_v23 = vsub.f32 %v589_v57, %v601_v21 }
 0x29f   :  { %v612_v60 = vmul.f32 1.442695, %v605_v23 }
 0x2a0   :  { %v592_v15 = vpop.xlane.xlu1 %591 }
 0x2a1   :  { %v602_v16 = vsub.f32 %v586_v63, %v592_v15 }
 0x2a3   :  { %v606_v22 = vmul.f32 1.442695, %v602_v16 }
 0x2a4   :  { %v598_v13 = vpop.xlane.xlu2 %597  ;;  %v595_v31 = vpop.xlane.xlu0 %594 }
 0x2a5   :  { %1733 = vpow2.f32 %v606_v22  ;;  %v604_v24 = vsub.f32 %v588_v4, %v598_v13  ;;  %v603_v25 = vsub.f32 %v587_v6, %v595_v31 }
 0x2a7   :  { %v610_v26 = vmul.f32 1.442695, %v604_v24  ;;  %v608_v9 = vmul.f32 1.442695, %v603_v25 }
 0x2a9   :  { %1735 = vpow2.f32 %v610_v26 }
 0x2aa   :  { %1737 = vpow2.f32 %v608_v9 }
 0x2ab   :  { %v2172_v30 = vpop.eup %1733  ;;  %1739 = vpow2.f32 %v612_v60 }
 0x2ac   :  { %v1688_v28 = vpop.permute.xlu2 %1687  ;;  %v614_v29 = vsel %vm504_vm2, %v2172_v30, 0.0 }
 0x2ad   :  { %v1690_v33 = vunpack.i.h.bf16 %v1688_v28  ;;  %v1689_v34 = vunpack.i.l.bf16 %v1688_v28  ;;  %615 = vadd.xlane.f32.xlu2 %v614_v29 }
 0x2af   :  { %v2176_v36 = vpop.eup %1735  ;;  %v399_v37 = vsel %vm142_vm1, %v398_v27, %v1690_v33  ;;  %v400_v38 = vrot.slane %v1690_v33, 4  ;;  %v387_v39 = vsel %vm142_vm1, %v386_v32, %v1689_v34  ;;  %v388_v40 = vrot.slane %v1689_v34, 4 }
 0x2b0   :  { %v2180_v41 = vpop.eup %1737  ;;  %v405_v42 = vperm.slane %v399_v37, %v1982_v20  ;;  %v393_v43 = vperm.slane %v387_v39, %v1982_v20  ;;  %v620_v44 = vsel %vm504_vm2, %v2176_v36, 0.0 }
 0x2b1   :  { %v401_v45 = vsel %vm142_vm1, %v1695_v7, %v400_v38  ;;  %v389_v47 = vsel %vm142_vm1, %v1694_v17, %v388_v40  ;;  %v617_v50 = vsel %vm504_vm2, %v2180_v41, 0.0  ;;  %621 = vadd.xlane.f32.xlu1 %v620_v44  ;;  %v2192_v58 = vpop.eup %1739 }
 0x2b2   :  { %v409_v54 = vperm.slane %v401_v45, %v1982_v20  ;;  %v410_v55 = vrot.slane %v405_v42, 4  ;;  %v397_v56 = vperm.slane %v389_v47, %v1982_v20  ;;  %v412_v57 = vrot.slane %v393_v43, 4  ;;  %618 = vadd.xlane.f32.xlu0 %v617_v50 }
 0x2b3   :  { %v623_v8 = vsel %vm504_vm2, %v2192_v58, 0.0 }
 0x2b4   :  { %v422_v59 = vrot.slane %v409_v54, 4  ;;  %v411_v61 = vsel %vm142_vm1, %v410_v55, %v393_v43  ;;  %v413_v63 = vsel %vm142_vm1, %v405_v42, %v412_v57  ;;  %v424_v0 = vrot.slane %v397_v56, 4  ;;  %v1703_v1 = vpop.permute.xlu2 %1702 }
 0x2b5   :  { %v417_v62 = vperm.slane %v411_v61, %v1992_v35  ;;  %v421_v2 = vperm.slane %v413_v63, %v1992_v35  ;;  %v1705_v3 = vunpack.i.h.bf16 %v1703_v1  ;;  %v1704_v5 = vunpack.i.l.bf16 %v1703_v1 }
 0x2b6   :  { %v423_v4 = vsel %vm142_vm1, %v422_v59, %v397_v56  ;;  %v425_v6 = vsel %vm142_vm1, %v409_v54, %v424_v0 }
 0x2b7   :  { %v429_v46 = vperm.slane %v423_v4, %v1992_v35  ;;  %v433_v10 = vperm.slane %v425_v6, %v1992_v35  ;;  %v434_v11 = vrot.slane %v417_v62, 4  ;;  %v436_v12 = vrot.slane %v421_v2, 4  ;;  %v1698_v19 = vpop.permute.xlu0 %1697 }
 0x2b8   :  { %v990_v21 = vrot.slane %v1705_v3, 4  ;;  %v978_v15 = vrot.slane %v1704_v5, 4  ;;  %v1700_v16 = vunpack.i.h.bf16 %v1698_v19  ;;  %v1699_v22 = vunpack.i.l.bf16 %v1698_v19 }
 0x2b9   :  { %v435_v13 = vsel %vm142_vm1, 0.0, %v434_v11  ;;  %v437_v31 = vsel %vm142_vm1, 0.0, %v436_v12  ;;  %v438_v23 = vrot.slane %v429_v46, 4  ;;  %v440_v24 = vrot.slane %v433_v10, 4  ;;  %624 = vadd.xlane.f32.xlu1 %v623_v8 }
 0x2ba   :  { %v442_v25 = vsel %vm142_vm1, %v436_v12, %v417_v62  ;;  %v447_v26 = vrot.slane %v437_v31, 4  ;;  %v991_v9 = vsel %vm142_vm1, %v990_v21, %v1700_v16  ;;  %v992_v7 = vrot.slane %v1700_v16, 4 }
 0x2bb   :  { %v439_v17 = vsel %vm142_vm1, 0.0, %v438_v23  ;;  %v441_v60 = vsel %vm142_vm1, 0.0, %v440_v24  ;;  %v446_v27 = vperm.slane %v442_v25, %v1982_v20  ;;  %v997_v28 = vperm.slane %v991_v9, %v1982_v20 }
 0x2bc   :  { %v458_v29 = vrot.slane %v441_v60, 4  ;;  %v993_v32 = vsel %vm142_vm1, %v1705_v3, %v992_v7  ;;  %v979_v33 = vsel %vm142_vm1, %v978_v15, %v1699_v22  ;;  %v980_v34 = vrot.slane %v1699_v22, 4 }
 0x2bd   :  { %v1001_v37 = vperm.slane %v993_v32, %v1982_v20  ;;  %v1002_v38 = vrot.slane %v997_v28, 4  ;;  %v985_v39 = vperm.slane %v979_v33, %v1982_v20  ;;  %v448_v40 = vsel %vm142_vm1, %v447_v26, %v435_v13 }
 0x2be   :  { %v981_v42 = vsel %vm142_vm1, %v1704_v5, %v980_v34  ;;  %v452_v43 = vperm.slane %v448_v40, %v1982_v20  ;;  %v453_v44 = vsel %vm142_vm1, %v440_v24, %v429_v46  ;;  %v459_v45 = vsel %vm142_vm1, %v458_v29, %v439_v17 }
 0x2bf   :  { %v1014_v47 = vrot.slane %v1001_v37, 4  ;;  %v989_v50 = vperm.slane %v981_v42, %v1982_v20  ;;  %v1003_v54 = vsel %vm142_vm1, %v1002_v38, %v985_v39  ;;  %v1004_v55 = vrot.slane %v985_v39, 4 }
 0x2c0   :  { %v1009_v56 = vperm.slane %v1003_v54, %v1992_v35  ;;  %v457_v57 = vperm.slane %v453_v44, %v1982_v20  ;;  %v463_v59 = vperm.slane %v459_v45, %v1982_v20  ;;  %v466_v61 = vrot.slane %v446_v27, 4 }
 0x2c1   :  { %v1005_v63 = vsel %vm142_vm1, %v997_v28, %v1004_v55  ;;  %v1015_v0 = vsel %vm142_vm1, %v1014_v47, %v989_v50  ;;  %v1016_v1 = vrot.slane %v989_v50, 4  ;;  %v464_v62 = vrot.slane %v452_v43, 4 }
 0x2c2   :  { %v1013_v2 = vperm.slane %v1005_v63, %v1992_v35  ;;  %v1021_v3 = vperm.slane %v1015_v0, %v1992_v35  ;;  %v1026_v5 = vrot.slane %v1009_v56, 4  ;;  %v467_v4 = vsel %vm142_vm1, %v452_v43, %v466_v61 }
 0x2c3   :  { %v1017_v6 = vsel %vm142_vm1, %v1001_v37, %v1016_v1  ;;  %v475_v8 = vperm.slane %v467_v4, %v1992_v35  ;;  %v478_v46 = vrot.slane %v457_v57, 4  ;;  %v465_v10 = vsel %vm142_vm1, %v464_v62, %v446_v27 }
 0x2c4   :  { %v1025_v11 = vperm.slane %v1017_v6, %v1992_v35  ;;  %v1027_v12 = vsel %vm142_vm1, 0.0, %v1026_v5  ;;  %v1028_v19 = vrot.slane %v1013_v2, 4  ;;  %v1030_v21 = vrot.slane %v1021_v3, 4 }
 0x2c5   :  { %v479_v15 = vsel %vm142_vm1, %v463_v59, %v478_v46  ;;  %v494_v16 = vrot.slane %v475_v8, 4  ;;  %v471_v22 = vperm.slane %v465_v10, %v1992_v35  ;;  %v476_v13 = vrot.slane %v463_v59, 4 }
 0x2c6   :  { %v1029_v31 = vsel %vm142_vm1, 0.0, %v1028_v19  ;;  %v1031_v23 = vsel %vm142_vm1, 0.0, %v1030_v21  ;;  %v1032_v24 = vrot.slane %v1025_v11, 4  ;;  %v1034_v25 = vsel %vm142_vm1, %v1028_v19, %v1009_v56  ;;  %1707 = vrot.lane.b32.xlu0 %v2160_v14, %s1894_s29 }
 0x2c7   :  { %v1038_v26 = vperm.slane %v1034_v25, %v1982_v20  ;;  %v1039_v9 = vrot.slane %v1029_v31, 4  ;;  %v487_v7 = vperm.slane %v479_v15, %v1992_v35  ;;  %v477_v17 = vsel %vm142_vm1, %v476_v13, %v457_v57 }
 0x2c8   :  { %v1033_v60 = vsel %vm142_vm1, 0.0, %v1032_v24  ;;  %v483_v27 = vperm.slane %v477_v17, %v1992_v35  ;;  %v490_v28 = vrot.slane %v471_v22, 4  ;;  %v1045_v29 = vsel %vm142_vm1, %v1032_v24, %v1021_v3 }
 0x2c9   :  { %v1050_v32 = vrot.slane %v1033_v60, 4  ;;  %v495_v33 = vsel %vm142_vm1, %v487_v7, %v494_v16  ;;  %v492_v34 = vrot.slane %v487_v7, 4  ;;  %v1040_v14 = vsel %vm142_vm1, %v1039_v9, %v1027_v12 }
 0x2ca   :  { %v641_v37 = vpack.c.bf16 %v495_v33, %v495_v33  ;;  %v491_v38 = vsel %vm142_vm1, %v483_v27, %v490_v28  ;;  %v488_v39 = vrot.slane %v483_v27, 4  ;;  %v1044_v40 = vperm.slane %v1040_v14, %v1982_v20 }
 0x2cb   :  { %v639_v42 = vpack.c.bf16 %v491_v38, %v491_v38  ;;  %v493_v43 = vsel %vm142_vm1, %v492_v34, %v475_v8  ;;  %v1049_v44 = vperm.slane %v1045_v29, %v1982_v20  ;;  %v1051_v45 = vsel %vm142_vm1, %v1050_v32, %v1031_v23 }
 0x2cc   :  { %v704_v47 = vsel %vm645_vm3, %v641_v37, 0  ;;  %v640_v50 = vpack.c.bf16 %v493_v43, %v493_v43  ;;  %v489_v54 = vsel %vm142_vm1, %v488_v39, %v471_v22  ;;  %v1055_v55 = vperm.slane %v1051_v45, %v1982_v20 }
 0x2cd   :  { %713 = vmatpush.bf16.msra.mxu0 %v704_v47  ;;  %v666_v56 = vsel %vm645_vm3, %v639_v42, 0  ;;  %v638_v57 = vpack.c.bf16 %v489_v54, %v489_v54  ;;  %v1058_v59 = vrot.slane %v1038_v26, 4  ;;  %v1070_v61 = vrot.slane %v1049_v44, 4 }
 0x2ce   :  { %675 = vmatpush.bf16.msrb.mxu2 %v666_v56  ;;  %v685_v63 = vsel %vm645_vm3, %v640_v50, 0  ;;  %v1056_v0 = vrot.slane %v1044_v40, 4  ;;  %v1068_v1 = vrot.slane %v1055_v55, 4  ;;  %v1211_v45 = vpack.c.bf16 %v2149_v52, %v2149_v52 }
 0x2cf   :  { %694 = vmatpush.bf16.msrb.mxu3 %v685_v63  ;;  %v647_v62 = vsel %vm645_vm3, %v638_v57, 0  ;;  %v1059_v2 = vsel %vm142_vm1, %v1044_v40, %v1058_v59  ;;  %v1071_v3 = vsel %vm142_vm1, %v1055_v55, %v1070_v61 }
 0x2d0   :  { %656 = vmatpush.bf16.msrb.mxu1 %v647_v62  ;;  %v1067_v5 = vperm.slane %v1059_v2, %v1992_v35  ;;  %v1079_v4 = vperm.slane %v1071_v3, %v1992_v35  ;;  %v1057_v6 = vsel %vm142_vm1, %v1056_v0, %v1038_v26  ;;  %v1069_v8 = vsel %vm142_vm1, %v1068_v1, %v1049_v44 }
 0x2d1   :  { %v1063_v46 = vperm.slane %v1057_v6, %v1992_v35  ;;  %v1075_v10 = vperm.slane %v1069_v8, %v1992_v35  ;;  %v2306_v3 = vunpack.c.h.bf16 %v2151_v53 }
 0x2d2   :  { %v1086_v11 = vrot.slane %v1067_v5, 4  ;;  %v1084_v12 = vrot.slane %v1079_v4, 4 }
 0x2d3   :  { %v1082_v19 = vrot.slane %v1063_v46, 4  ;;  %v1080_v21 = vrot.slane %v1075_v10, 4 }
 0x2d4   :  { %v1087_v15 = vsel %vm142_vm1, %v1079_v4, %v1086_v11  ;;  %v1085_v16 = vsel %vm142_vm1, %v1084_v12, %v1067_v5 }
 0x2d5   :  { %v1217_v22 = vpack.c.bf16 %v1087_v15, %v1087_v15  ;;  %v1083_v13 = vsel %vm142_vm1, %v1075_v10, %v1082_v19  ;;  %v1216_v31 = vpack.c.bf16 %v1085_v16, %v1085_v16  ;;  %v1081_v23 = vsel %vm142_vm1, %v1080_v21, %v1063_v46 }
 0x2d6   :  { %v1215_v24 = vpack.c.bf16 %v1083_v13, %v1083_v13  ;;  %v1214_v25 = vpack.c.bf16 %v1081_v23, %v1081_v23 }
 0x2d7   :  { %v1279_v26 = vsel %vm504_vm2, %v1217_v22, 0  ;;  %v1260_v9 = vsel %vm504_vm2, %v1216_v31, 0 }
 0x2d8   :  { %1288 = vmatpush.bf16.xpose.msrb.mxu0 %v1279_v26  ;;  %v1241_v7 = vsel %vm504_vm2, %v1215_v24, 0  ;;  %1269 = vmatpush.bf16.xpose.msra.mxu3 %v1260_v9  ;;  %v1222_v17 = vsel %vm504_vm2, %v1214_v25, 0 }
 0x2d9   :  { %1250 = vmatpush.bf16.xpose.msra.mxu2 %v1241_v7  ;;  %1231 = vmatpush.bf16.xpose.msra.mxu1 %v1222_v17 }
 0x320   :  { %v616_v60 = vpop.xlane.xlu2 %615 }
 0x321   :  { %1741 = vrcp.f32 %v616_v60 }
 0x324   :  { %v622_v27 = vpop.xlane.xlu1 %621 }
 0x325   :  { %v619_v28 = vpop.xlane.xlu0 %618  ;;  %1743 = vrcp.f32 %v622_v27 }
 0x326   :  { %1745 = vrcp.f32 %v619_v28 }
 0x327   :  { %v1742_v29 = vpop.eup %1741 }
 0x328   :  { %v630_v32 = vmul.f32 %v1742_v29, %v2172_v30 }
 0x32a   :  { %v634_v33 = vpack.c.bf16 %v630_v32, %v630_v32 }
 0x32b   :  { %v1744_v34 = vpop.eup %1743 }
 0x32c   :  { %v1746_v14 = vpop.eup %1745  ;;  %v632_v37 = vmul.f32 %v1744_v34, %v2176_v36  ;;  %1630 = vmatmul.msk.bf16.vlgmr.msrb.gmra.mxu1 %vm504_vm2, %v634_v33  ;;  %v625_v38 = vpop.xlane.xlu1 %624  ;;  %v1210_v36 = vpack.c.bf16 %v2143_v49, %v2143_v49 }
 0x32d   :  { %v631_v39 = vmul.f32 %v1746_v14, %v2180_v41  ;;  %1747 = vrcp.f32 %v625_v38  ;;  %v1212_v41 = vpack.c.bf16 %v2140_v48, %v2140_v48 }
 0x32e   :  { %v636_v40 = vpack.c.bf16 %v632_v37, %v632_v37 }
 0x32f   :  { %v635_v42 = vpack.c.bf16 %v631_v39, %v631_v39 }
 0x330   :  { %1632 = vmatmul.msk.bf16.vlgmr.msrb.gmra.mxu3 %vm504_vm2, %v636_v40 }
 0x331   :  { %1631 = vmatmul.msk.bf16.vlgmr.msrb.gmra.mxu2 %vm504_vm2, %v635_v42 }
 0x333   :  { %v1748_v43 = vpop.eup %1747 }
 0x334   :  { %v633_v30 = vmul.f32 %v1748_v43, %v2192_v58  ;;  %v1213_v58 = vpack.c.bf16 %v2146_v51, %v2146_v51 }
 0x336   :  { %v637_v44 = vpack.c.bf16 %v633_v30, %v633_v30 }
 0x338   :  { %1633 = vmatmul.msk.bf16.vlgmr.msra.gmra.mxu0 %vm504_vm2, %v637_v44 }
 0x33c   :  { %1634 = vmatmul.msk.bf16.vlgmr.msra.gmra.mxu1 %vm504_vm2, %v1210_v36 }
 0x340   :  { %1636 = vmatmul.msk.bf16.vlgmr.msra.gmra.mxu3 %vm504_vm2, %v1212_v41 }
 0x341   :  { %1635 = vmatmul.msk.bf16.vlgmr.msra.gmra.mxu2 %vm504_vm2, %v1211_v45 }
 0x348   :  { %1637 = vmatmul.msk.bf16.vlgmr.msrb.gmra.mxu0 %vm504_vm2, %v1213_v58 }
 0x3a9   :  { %v658_v47 = vpop.f32.mrf.mxu1 }
 0x3aa   :  { %v721_v49 = vrot.slane %v658_v47, 4 }
 0x3b1   :  { %v660_v50 = vpop.f32.mrf.mxu1 }
 0x3b3   :  { %v696_v54 = vpop.f32.mrf.mxu3 }
 0x3b4   :  { %v677_v55 = vpop.f32.mrf.mxu2  ;;  %v719_v56 = vrot.slane %v696_v54, 4  ;;  %v722_v48 = vsel %vm142_vm1, %v696_v54, %v721_v49 }
 0x3b5   :  { %v733_v57 = vrot.slane %v677_v55, 4  ;;  %v730_v52 = vperm.slane %v722_v48, %v1982_v20  ;;  %v715_v59 = vpop.f32.mrf.mxu0 }
 0x3b6   :  { %v720_v61 = vsel %vm142_vm1, %v719_v56, %v658_v47  ;;  %v731_v63 = vrot.slane %v715_v59, 4 }
 0x3b7   :  { %v726_v0 = vperm.slane %v720_v61, %v1982_v20  ;;  %v757_v51 = vrot.slane %v730_v52, 4  ;;  %v734_v1 = vsel %vm142_vm1, %v715_v59, %v733_v57 }
 0x3b8   :  { %v732_v62 = vsel %vm142_vm1, %v731_v63, %v677_v55  ;;  %v742_v2 = vperm.slane %v734_v1, %v1982_v20 }
 0x3b9   :  { %v745_v5 = vrot.slane %v726_v0, 4  ;;  %v738_v4 = vperm.slane %v732_v62, %v1982_v20  ;;  %v1233_v6 = vpop.f32.mrf.mxu1 }
 0x3ba   :  { %v755_v8 = vrot.slane %v742_v2, 4  ;;  %v758_v46 = vsel %vm142_vm1, %v742_v2, %v757_v51  ;;  %v1294_v10 = vmul.f32 0.35355338, %v1233_v6 }
 0x3bb   :  { %v743_v11 = vrot.slane %v738_v4, 4  ;;  %v746_v12 = vsel %vm142_vm1, %v738_v4, %v745_v5  ;;  %v766_v19 = vperm.slane %v758_v46, %v1992_v35  ;;  %v698_v21 = vpop.f32.mrf.mxu3 }
 0x3bc   :  { %v754_v15 = vperm.slane %v746_v12, %v1992_v35  ;;  %v756_v16 = vsel %vm142_vm1, %v755_v8, %v730_v52  ;;  %v679_v53 = vpop.f32.mrf.mxu2  ;;  %v2315_v22 = vadd.f32 %v2306_v3, %v1294_v10 }
 0x3bd   :  { %v744_v13 = vsel %vm142_vm1, %v743_v11, %v726_v0  ;;  %v762_v31 = vperm.slane %v756_v16, %v1992_v35  ;;  %v773_v23 = vrot.slane %v766_v19, 4  ;;  %v717_v24 = vpop.f32.mrf.mxu0 }
 0x3be   :  { %v750_v25 = vperm.slane %v744_v13, %v1992_v35  ;;  %v769_v26 = vrot.slane %v754_v15, 4  ;;  %v1303_v9 = vsel %vm504_vm2, %v2315_v22, -inf }
 0x3bf   :  { %v771_v7 = vrot.slane %v762_v31, 4  ;;  %v774_v17 = vsel %vm142_vm1, 0.0, %v773_v23  ;;  %v786_v60 = vsel %vm142_vm1, %v773_v23, %v762_v31  ;;  %1304 = vmax.xlane.f32.xlu1 %v1303_v9 }
 0x3c0   :  { %v767_v27 = vrot.slane %v750_v25, 4  ;;  %v770_v28 = vsel %vm142_vm1, 0.0, %v769_v26  ;;  %v775_v29 = vsel %vm142_vm1, %v769_v26, %v750_v25  ;;  %v790_v32 = vperm.slane %v786_v60, %v1982_v20 }
 0x3c1   :  { %v772_v33 = vsel %vm142_vm1, 0.0, %v771_v7  ;;  %v780_v34 = vrot.slane %v770_v28, 4  ;;  %v791_v14 = vrot.slane %v774_v17, 4  ;;  %v1235_v37 = vpop.f32.mrf.mxu1  ;;  %v779_v38 = vperm.slane %v775_v29, %v1982_v20 }
 0x3c2   :  { %v811_v39 = vrot.slane %v790_v32, 4  ;;  %v768_v40 = vsel %vm142_vm1, 0.0, %v767_v27  ;;  %v1708_v37 = vpop.permute.xlu0 %1707 }
 0x3c3   :  { %v792_v42 = vsel %vm142_vm1, %v791_v14, %v772_v33  ;;  %v1271_v43 = vpop.f32.mrf.mxu3  ;;  %v781_v30 = vsel %vm142_vm1, %v780_v34, %v768_v40  ;;  %v799_v44 = vrot.slane %v779_v38, 4 }
 0x3c4   :  { %v796_v36 = vperm.slane %v792_v42, %v1982_v20  ;;  %v1252_v41 = vpop.f32.mrf.mxu2  ;;  %v785_v45 = vperm.slane %v781_v30, %v1982_v20  ;;  %v1296_v63 = vmul.f32 0.35355338, %v1271_v43 }
 0x3c5   :  { %v1290_v58 = vpop.f32.mrf.mxu0  ;;  %v1295_v21 = vmul.f32 0.35355338, %v1252_v41 }
 0x3c6   :  { %v1297_v47 = vmul.f32 0.35355338, %v1290_v58  ;;  %v800_v50 = vsel %vm142_vm1, %v785_v45, %v799_v44  ;;  %v812_v49 = vsel %vm142_vm1, %v796_v36, %v811_v39  ;;  %v797_v56 = vrot.slane %v785_v45, 4 }
 0x3c7   :  { %v808_v54 = vperm.slane %v800_v50, %v1992_v35  ;;  %v820_v55 = vperm.slane %v812_v49, %v1992_v35  ;;  %v809_v57 = vrot.slane %v796_v36, 4  ;;  %v1301_v11 = vadd.f32 %v2306_v3, %v1296_v63 }
 0x3c8   :  { %v1302_v48 = vadd.f32 %v2306_v3, %v1297_v47  ;;  %v798_v59 = vsel %vm142_vm1, %v797_v56, %v779_v38  ;;  %v1300_v16 = vadd.f32 %v2306_v3, %v1295_v21  ;;  %v1710_v38 = vunpack.i.h.bf16 %v1708_v37 }
 0x3c9   :  { %v825_v52 = vrot.slane %v820_v55, 4  ;;  %v827_v61 = vrot.slane %v808_v54, 4  ;;  %v804_v51 = vperm.slane %v798_v59, %v1992_v35  ;;  %v810_v1 = vsel %vm142_vm1, %v809_v57, %v790_v32 }
 0x3ca   :  { %v1312_v0 = vsel %vm504_vm2, %v1302_v48, -inf  ;;  %v816_v5 = vperm.slane %v810_v1, %v1992_v35  ;;  %v1309_v15 = vsel %vm504_vm2, %v1301_v11, -inf  ;;  %v1306_v53 = vsel %vm504_vm2, %v1300_v16, -inf }
 0x3cb   :  { %v1273_v62 = vpop.f32.mrf.mxu3  ;;  %1313 = vmax.xlane.f32.xlu1 %v1312_v0  ;;  %v2344_v2 = vsel %vm142_vm1, %v825_v52, %v808_v54  ;;  %v2348_v4 = vsel %vm142_vm1, %v820_v55, %v827_v61  ;;  %v823_v8 = vrot.slane %v804_v51, 4  ;;  %v1709_v39 = vunpack.i.l.bf16 %v1708_v37 }
 0x3cc   :  { %v1254_v6 = vpop.f32.mrf.mxu2  ;;  %v821_v10 = vrot.slane %v816_v5, 4  ;;  %v1114_v42 = vrot.slane %v1710_v38, 4 }
 0x3cd   :  { %v1292_v46 = vpop.f32.mrf.mxu0  ;;  %v2352_v12 = vsel %vm142_vm1, %v816_v5, %v823_v8  ;;  %v1102_v43 = vrot.slane %v1709_v39, 4 }
 0x3ce   :  { %v2355_v19 = vsel %vm142_vm1, %v821_v10, %v804_v51 }
 0x3d3   :  { %1310 = vmax.xlane.f32.xlu1 %v1309_v15 }
 0x3db   :  { %1307 = vmax.xlane.f32.xlu1 %v1306_v53 }
 0x3f4   :  { %1712 = vrot.lane.b32.xlu1 %v2168_v18, %s1894_s29 }
 0x432   :  { %v1305_v13 = vpop.xlane.xlu1 %1304 }
 0x433   :  { %v1315_v18 = vsub.f32 %v2315_v22, %v1305_v13 }
 0x435   :  { %v1319_v32 = vmul.f32 1.442695, %v1315_v18 }
 0x43e   :  { %v1314_v31 = vpop.xlane.xlu1 %1313 }
 0x43f   :  { %v1318_v23 = vsub.f32 %v1302_v48, %v1314_v31 }
 0x441   :  { %v1325_v24 = vmul.f32 1.442695, %v1318_v23 }
 0x443   :  { %1749 = vpow2.f32 %v1325_v24 }
 0x446   :  { %v1311_v25 = vpop.xlane.xlu1 %1310 }
 0x447   :  { %v1317_v26 = vsub.f32 %v1301_v11, %v1311_v25 }
 0x449   :  { %v2362_v9 = vpop.eup %1749  ;;  %v1323_v7 = vmul.f32 1.442695, %v1317_v26 }
 0x44a   :  { %v1336_v17 = vsel %vm504_vm2, %v2362_v9, 0.0 }
 0x44b   :  { %1751 = vpow2.f32 %v1323_v7  ;;  %1337 = vadd.xlane.f32.xlu0 %v1336_v17 }
 0x44e   :  { %v1308_v3 = vpop.xlane.xlu1 %1307 }
 0x44f   :  { %v1316_v60 = vsub.f32 %v1300_v16, %v1308_v3 }
 0x451   :  { %v2366_v27 = vpop.eup %1751  ;;  %v1321_v28 = vmul.f32 1.442695, %v1316_v60 }
 0x452   :  { %v1333_v29 = vsel %vm504_vm2, %v2366_v27, 0.0 }
 0x453   :  { %1753 = vpow2.f32 %v1321_v28  ;;  %1334 = vadd.xlane.f32.xlu2 %v1333_v29 }
 0x454   :  { %1755 = vpow2.f32 %v1319_v32 }
 0x459   :  { %v2371_v33 = vpop.eup %1753 }
 0x45a   :  { %v1330_v34 = vsel %vm504_vm2, %v2371_v33, 0.0  ;;  %v2375_v14 = vpop.eup %1755 }
 0x45b   :  { %1331 = vadd.xlane.f32.xlu2 %v1330_v34  ;;  %v1327_v22 = vsel %vm504_vm2, %v2375_v14, 0.0 }
 0x463   :  { %1328 = vadd.xlane.f32.xlu2 %v1327_v22 }
 0x466   :  { %v1713_v40 = vpop.permute.xlu1 %1712 }
 0x467   :  { %v1715_v30 = vunpack.i.h.bf16 %v1713_v40  ;;  %v1714_v44 = vunpack.i.l.bf16 %v1713_v40 }
 0x469   :  { %v1112_v36 = vrot.slane %v1715_v30, 4  ;;  %v1115_v41 = vsel %vm142_vm1, %v1715_v30, %v1114_v42  ;;  %v1100_v45 = vrot.slane %v1714_v44, 4  ;;  %v1103_v58 = vsel %vm142_vm1, %v1714_v44, %v1102_v43 }
 0x46a   :  { %v1123_v47 = vperm.slane %v1115_v41, %v1982_v20  ;;  %v1111_v50 = vperm.slane %v1103_v58, %v1982_v20 }
 0x46b   :  { %v1113_v49 = vsel %vm142_vm1, %v1112_v36, %v1710_v38  ;;  %v1101_v54 = vsel %vm142_vm1, %v1100_v45, %v1709_v39 }
 0x46c   :  { %v1119_v55 = vperm.slane %v1113_v49, %v1982_v20  ;;  %v1136_v56 = vrot.slane %v1123_v47, 4  ;;  %v1107_v48 = vperm.slane %v1101_v54, %v1982_v20  ;;  %v1138_v57 = vrot.slane %v1111_v50, 4 }
 0x46e   :  { %v1124_v52 = vrot.slane %v1119_v55, 4  ;;  %v1126_v59 = vrot.slane %v1107_v48, 4  ;;  %v1137_v61 = vsel %vm142_vm1, %v1136_v56, %v1111_v50  ;;  %v1139_v63 = vsel %vm142_vm1, %v1123_v47, %v1138_v57 }
 0x46f   :  { %v1143_v0 = vperm.slane %v1137_v61, %v1992_v35  ;;  %v1147_v51 = vperm.slane %v1139_v63, %v1992_v35 }
 0x470   :  { %v1125_v1 = vsel %vm142_vm1, %v1124_v52, %v1107_v48  ;;  %v1127_v62 = vsel %vm142_vm1, %v1119_v55, %v1126_v59 }
 0x471   :  { %v1131_v5 = vperm.slane %v1125_v1, %v1992_v35  ;;  %v1135_v6 = vperm.slane %v1127_v62, %v1992_v35  ;;  %v1152_v8 = vrot.slane %v1143_v0, 4  ;;  %v1154_v46 = vrot.slane %v1147_v51, 4 }
 0x473   :  { %v1148_v10 = vrot.slane %v1131_v5, 4  ;;  %v1150_v11 = vrot.slane %v1135_v6, 4  ;;  %v1155_v21 = vsel %vm142_vm1, 0.0, %v1154_v46  ;;  %v1167_v15 = vsel %vm142_vm1, %v1154_v46, %v1143_v0 }
 0x474   :  { %v1172_v16 = vrot.slane %v1155_v21, 4  ;;  %v1153_v13 = vsel %vm142_vm1, 0.0, %v1152_v8  ;;  %v1171_v31 = vperm.slane %v1167_v15, %v1982_v20 }
 0x475   :  { %v1151_v53 = vsel %vm142_vm1, 0.0, %v1150_v11  ;;  %v1156_v23 = vsel %vm142_vm1, %v1150_v11, %v1131_v5  ;;  %v1149_v7 = vsel %vm142_vm1, 0.0, %v1148_v10 }
 0x476   :  { %v1161_v24 = vrot.slane %v1151_v53, 4  ;;  %v1160_v25 = vperm.slane %v1156_v23, %v1982_v20  ;;  %v1173_v26 = vsel %vm142_vm1, %v1172_v16, %v1153_v13  ;;  %v1192_v3 = vrot.slane %v1171_v31, 4 }
 0x477   :  { %v1177_v17 = vperm.slane %v1173_v26, %v1982_v20 }
 0x478   :  { %v1162_v60 = vsel %vm142_vm1, %v1161_v24, %v1149_v7  ;;  %v1180_v18 = vrot.slane %v1160_v25, 4 }
 0x479   :  { %v1166_v28 = vperm.slane %v1162_v60, %v1982_v20  ;;  %v1193_v29 = vsel %vm142_vm1, %v1177_v17, %v1192_v3  ;;  %v1190_v32 = vrot.slane %v1177_v17, 4 }
 0x47a   :  { %v1201_v34 = vperm.slane %v1193_v29, %v1992_v35 }
 0x47b   :  { %v1181_v37 = vsel %vm142_vm1, %v1166_v28, %v1180_v18  ;;  %v1178_v22 = vrot.slane %v1166_v28, 4  ;;  %v1191_v38 = vsel %vm142_vm1, %v1190_v32, %v1171_v31 }
 0x47c   :  { %v1189_v39 = vperm.slane %v1181_v37, %v1992_v35  ;;  %v1206_v40 = vrot.slane %v1201_v34, 4  ;;  %v1197_v42 = vperm.slane %v1191_v38, %v1992_v35 }
 0x47d   :  { %v1179_v43 = vsel %vm142_vm1, %v1178_v22, %v1160_v25 }
 0x47e   :  { %v1207_v30 = vsel %vm142_vm1, %v1206_v40, %v1189_v39  ;;  %v1185_v44 = vperm.slane %v1179_v43, %v1992_v35  ;;  %v1202_v36 = vrot.slane %v1197_v42, 4  ;;  %v1208_v41 = vrot.slane %v1189_v39, 4 }
 0x47f   :  { %v1353_v45 = vpack.c.bf16 %v1207_v30, %v1207_v30 }
 0x480   :  { %v1203_v58 = vsel %vm142_vm1, %v1202_v36, %v1185_v44  ;;  %v1209_v47 = vsel %vm142_vm1, %v1201_v34, %v1208_v41  ;;  %v1204_v50 = vrot.slane %v1185_v44, 4 }
 0x481   :  { %v1397_v49 = vsel %vm645_vm3, %v1353_v45, 0  ;;  %v1351_v54 = vpack.c.bf16 %v1203_v58, %v1203_v58  ;;  %v1354_v55 = vpack.c.bf16 %v1209_v47, %v1209_v47 }
 0x482   :  { %1406 = vmatpush.bf16.msrb.mxu3 %v1397_v49  ;;  %v1205_v56 = vsel %vm142_vm1, %v1197_v42, %v1204_v50 }
 0x483   :  { %v1359_v48 = vsel %vm645_vm3, %v1351_v54, 0  ;;  %v1416_v57 = vsel %vm645_vm3, %v1354_v55, 0  ;;  %v1352_v52 = vpack.c.bf16 %v1205_v56, %v1205_v56 }
 0x484   :  { %1368 = vmatpush.bf16.msrb.mxu1 %v1359_v48  ;;  %1425 = vmatpush.bf16.msra.mxu0 %v1416_v57 }
 0x485   :  { %v1378_v59 = vsel %vm645_vm3, %v1352_v52, 0 }
 0x486   :  { %1387 = vmatpush.bf16.msrb.mxu2 %v1378_v59 }
 0x4be   :  { %v1338_v61 = vpop.xlane.xlu0 %1337 }
 0x4bf   :  { %1757 = vrcp.f32 %v1338_v61 }
 0x4c5   :  { %v1758_v63 = vpop.eup %1757 }
 0x4c6   :  { %v1346_v0 = vmul.f32 %v1758_v63, %v2362_v9  ;;  %v1335_v51 = vpop.xlane.xlu2 %1334 }
 0x4c7   :  { %1759 = vrcp.f32 %v1335_v51 }
 0x4c8   :  { %v1350_v1 = vpack.c.bf16 %v1346_v0, %v1346_v0 }
 0x4ca   :  { %1641 = vmatmul.msk.bf16.vlgmr.msra.gmra.mxu0 %vm504_vm2, %v1350_v1 }
 0x4cd   :  { %v1760_v62 = vpop.eup %1759 }
 0x4ce   :  { %v1345_v5 = vmul.f32 %v1760_v62, %v2366_v27  ;;  %v1332_v6 = vpop.xlane.xlu2 %1331 }
 0x4cf   :  { %1761 = vrcp.f32 %v1332_v6 }
 0x4d0   :  { %v1349_v8 = vpack.c.bf16 %v1345_v5, %v1345_v5 }
 0x4d2   :  { %1640 = vmatmul.msk.bf16.vlgmr.msrb.gmra.mxu3 %vm504_vm2, %v1349_v8 }
 0x4d5   :  { %v1762_v46 = vpop.eup %1761 }
 0x4d6   :  { %v1344_v10 = vmul.f32 %v1762_v46, %v2371_v33  ;;  %v1329_v11 = vpop.xlane.xlu2 %1328 }
 0x4d7   :  { %1763 = vrcp.f32 %v1329_v11 }
 0x4d8   :  { %v1348_v21 = vpack.c.bf16 %v1344_v10, %v1344_v10 }
 0x4da   :  { %1639 = vmatmul.msk.bf16.vlgmr.msrb.gmra.mxu2 %vm504_vm2, %v1348_v21 }
 0x4dd   :  { %v1764_v9 = vpop.eup %1763 }
 0x4de   :  { %v1343_v15 = vmul.f32 %v1764_v9, %v2375_v14 }
 0x4e0   :  { %v1347_v16 = vpack.c.bf16 %v1343_v15, %v1343_v15 }
 0x4e2   :  { %1638 = vmatmul.msk.bf16.vlgmr.msrb.gmra.mxu1 %vm504_vm2, %v1347_v16 }
 0x547   :  { %v1427_v27 = vpop.f32.mrf.mxu0 }
 0x548   :  { %v1443_v31 = vrot.slane %v1427_v27, 4 }
 0x54f   :  { %v1429_v53 = vpop.f32.mrf.mxu0 }
 0x555   :  { %v1408_v13 = vpop.f32.mrf.mxu3 }
 0x556   :  { %v1431_v25 = vrot.slane %v1408_v13, 4 }
 0x55d   :  { %v1389_v23 = vpop.f32.mrf.mxu2  ;;  %v1410_v24 = vpop.f32.mrf.mxu3 }
 0x55e   :  { %v1444_v33 = vsel %vm142_vm1, %v1443_v31, %v1389_v23  ;;  %v1445_v26 = vrot.slane %v1389_v23, 4 }
 0x55f   :  { %v1450_v7 = vperm.slane %v1444_v33, %v1982_v20  ;;  %v1370_v17 = vpop.f32.mrf.mxu1 }
 0x560   :  { %v1446_v3 = vsel %vm142_vm1, %v1427_v27, %v1445_v26  ;;  %v1432_v14 = vsel %vm142_vm1, %v1431_v25, %v1370_v17  ;;  %v1433_v60 = vrot.slane %v1370_v17, 4 }
 0x561   :  { %v1454_v18 = vperm.slane %v1446_v3, %v1982_v20  ;;  %v1455_v28 = vrot.slane %v1450_v7, 4  ;;  %v1438_v29 = vperm.slane %v1432_v14, %v1982_v20 }
 0x562   :  { %v1434_v32 = vsel %vm142_vm1, %v1408_v13, %v1433_v60  ;;  %v1654_v60 = vld [vmem:[#allocation8 + $0x8] sm:$0xff] }
 0x563   :  { %v1467_v34 = vrot.slane %v1454_v18, 4  ;;  %v1442_v37 = vperm.slane %v1434_v32, %v1982_v20  ;;  %v1456_v22 = vsel %vm142_vm1, %v1455_v28, %v1438_v29  ;;  %v1457_v38 = vrot.slane %v1438_v29, 4  ;;  %1586 = vmatpush.bf16.msra.mxu1 %v1654_v60 }
 0x564   :  { %v1462_v39 = vperm.slane %v1456_v22, %v1992_v35 }
 0x565   :  { %v1458_v40 = vsel %vm142_vm1, %v1450_v7, %v1457_v38  ;;  %v1468_v42 = vsel %vm142_vm1, %v1467_v34, %v1442_v37  ;;  %v1469_v43 = vrot.slane %v1442_v37, 4  ;;  %v1391_v30 = vpop.f32.mrf.mxu2 }
 0x566   :  { %v1466_v44 = vperm.slane %v1458_v40, %v1992_v35  ;;  %v1474_v36 = vperm.slane %v1468_v42, %v1992_v35  ;;  %v1479_v47 = vrot.slane %v1462_v39, 4 }
 0x567   :  { %v1470_v41 = vsel %vm142_vm1, %v1454_v18, %v1469_v43  ;;  %v1372_v45 = vpop.f32.mrf.mxu1  ;;  %v1653_v18 = vld [vmem:[#allocation8] sm:$0xff] }
 0x568   :  { %v1478_v58 = vperm.slane %v1470_v41, %v1992_v35  ;;  %v1481_v50 = vrot.slane %v1466_v44, 4  ;;  %v1483_v54 = vrot.slane %v1474_v36, 4  ;;  %v1480_v52 = vsel %vm142_vm1, 0.0, %v1479_v47  ;;  %1587 = vmatpush.bf16.msra.mxu1 %v1653_v18 }
 0x56a   :  { %v1482_v49 = vsel %vm142_vm1, 0.0, %v1481_v50  ;;  %v1485_v55 = vrot.slane %v1478_v58, 4  ;;  %v1487_v56 = vsel %vm142_vm1, %v1481_v50, %v1462_v39  ;;  %v1484_v1 = vsel %vm142_vm1, 0.0, %v1483_v54 }
 0x56b   :  { %v1491_v48 = vperm.slane %v1487_v56, %v1982_v20  ;;  %v1492_v57 = vrot.slane %v1482_v49, 4 }
 0x56c   :  { %v1486_v59 = vsel %vm142_vm1, 0.0, %v1485_v55  ;;  %v1498_v61 = vsel %vm142_vm1, %v1485_v55, %v1474_v36  ;;  %v1732_v36 = vld [vmem:[%s2495_s5] ss:$0 sm:$0xff] }
 0x56d   :  { %v1493_v63 = vsel %vm142_vm1, %v1492_v57, %v1480_v52  ;;  %v1502_v0 = vperm.slane %v1498_v61, %v1982_v20  ;;  %v1503_v51 = vrot.slane %v1486_v59, 4  ;;  %v1511_v5 = vrot.slane %v1491_v48, 4 }
 0x56e   :  { %v1497_v62 = vperm.slane %v1493_v63, %v1982_v20 }
 0x56f   :  { %v1504_v6 = vsel %vm142_vm1, %v1503_v51, %v1484_v1  ;;  %v1523_v8 = vrot.slane %v1502_v0, 4 }
 0x570   :  { %v1508_v46 = vperm.slane %v1504_v6, %v1982_v20  ;;  %v1509_v10 = vrot.slane %v1497_v62, 4  ;;  %v1512_v11 = vsel %vm142_vm1, %v1497_v62, %v1511_v5 }
 0x571   :  { %v1520_v13 = vperm.slane %v1512_v11, %v1992_v35 }
 0x572   :  { %v1524_v21 = vsel %vm142_vm1, %v1508_v46, %v1523_v8  ;;  %v1510_v9 = vsel %vm142_vm1, %v1509_v10, %v1491_v48  ;;  %v1521_v15 = vrot.slane %v1508_v46, 4 }
 0x573   :  { %v1532_v16 = vperm.slane %v1524_v21, %v1992_v35  ;;  %v1516_v27 = vperm.slane %v1510_v9, %v1992_v35  ;;  %v1539_v17 = vrot.slane %v1520_v13, 4 }
 0x574   :  { %v1522_v53 = vsel %vm142_vm1, %v1521_v15, %v1502_v0 }
 0x575   :  { %v1537_v31 = vrot.slane %v1532_v16, 4  ;;  %v1528_v23 = vperm.slane %v1522_v53, %v1992_v35  ;;  %v1535_v20 = vrot.slane %v1516_v27, 4  ;;  %v1540_v14 = vsel %vm142_vm1, %v1532_v16, %v1539_v17 }
 0x576   :  { %v1726_v35 = vpack.i.bf16 %v1540_v14, %v2348_v4 }
 0x577   :  { %v1538_v24 = vsel %vm142_vm1, %v1537_v31, %v1520_v13  ;;  %v1533_v25 = vrot.slane %v1528_v23, 4  ;;  %v1536_v33 = vsel %vm142_vm1, %v1528_v23, %v1535_v20 }
 0x578   :  { %v1721_v26 = vpack.i.bf16 %v1538_v24, %v2344_v2  ;;  %v1716_v7 = vpack.i.bf16 %v1536_v33, %v2352_v12 }
 0x579   :  { %v1534_v3 = vsel %vm142_vm1, %v1533_v25, %v1516_v27 }
 0x57a   :  { %1722 = vrot.lane.b32.xlu1 %v1721_v26, %s1907_s3  ;;  %1717 = vrot.lane.b32.xlu2 %v1716_v7, %s1898_s1 }
 0x582   :  { %1727 = vrot.lane.b32.xlu1 %v1726_v35, %s1908_s23 }
 0x5d4   :  { %v1718_v28 = vpop.permute.xlu2 %1717 }
 0x5d5   :  { %v1720_v12 = vunpack.i.h.bf16 %v1718_v28  ;;  %v1719_v29 = vunpack.i.l.bf16 %v1718_v28 }
 0x5d7   :  { %v841_v22 = vsel %vm504_vm2, %v2355_v19, %v1719_v29  ;;  %v1553_v4 = vsel %vm504_vm2, %v1534_v3, %v1720_v12 }
 0x5ec   :  { %v1723_v2 = vpop.permute.xlu1 %1722 }
 0x5ed   :  { %v1725_v32 = vunpack.i.h.bf16 %v1723_v2  ;;  %v1724_v34 = vunpack.i.l.bf16 %v1723_v2 }
 0x5ef   :  { %v843_v40 = vsel %vm842_vm4, %v841_v22, %v1724_v34  ;;  %v1554_v42 = vsel %vm842_vm4, %v1553_v4, %v1725_v32 }
 0x5f4   :  { %v1728_v37 = vpop.permute.xlu1 %1727 }
 0x5f5   :  { %v1730_v38 = vunpack.i.h.bf16 %v1728_v37  ;;  %v1729_v39 = vunpack.i.l.bf16 %v1728_v37 }
 0x5f7   :  { %v845_v43 = vsel %vm844_vm5, %v843_v40, %v1729_v39  ;;  %v1555_v30 = vsel %vm844_vm5, %v1554_v42, %v1730_v38 }
 0x5f8   :  { %v1556_v44 = vpack.c.bf16 %v1555_v30, %v845_v43 }
 0x5fa   :  { %1650 = vmatmul.msk.bf16.vlgmr.msra.gmra.mxu1 %vm111_vm0, %v1556_v44 }
 0x677   :  { %v1589_v41 = vpop.f32.mrf.mxu1 }
 0x678   :  { %v1590_v45 = vadd.f32 %v1732_v36, %v1589_v41 }
 0x67a   :  { %1594 = vst.msk [vmem:[#allocation10] sm:$0xff] %vm111_vm0, %v1590_v45 }
 0x67f   :  { %v1591_v19 = vpop.f32.mrf.mxu1 }
 0x680   :  { %v1592_v58 = vadd.f32 %v1732_v36, %v1591_v19 }
 0x682   :  { %1595 = vst.msk [vmem:[#allocation10 + $0x8] sm:$0xff] %vm111_vm0, %v1592_v58 }
 0x683   :  { %1608 = dma.vmem_to_hbm [thread:$0]  %s1601_s27, 256, %s1603_s30, [#allocation4], %s1897_s9, %s1897_s9, %s1898_s1  }
 0x684   :  { %1891 = dma.done.wait [#allocation4], 256  }
 0x685   :  { %1892 = vsyncadd [#allocation4], 4294967040 }
 0x686   :  { %1613 = vsyncpa [#allocation3], 1 }
 0x687   :  { %1614 = vsyncpa [#allocation6], 1 }
 0x688   :  { %1615 = vsyncpa [#allocation9], 1 }
 0x689   :  { %1616 = vsyncpa [#allocation4], 1 }

</bundles_post_ra>
